<compile_context>
chip_gen: v5e
topology: v5e:2x2
jax: 0.10.0
libtpu: 0.0.40
codegen_flags: <defaults>
</compile_context>

<pallas_src>
import functools
import math

import jax
import jax.numpy as jnp
import numpy as np
from jax.experimental import pallas as pl
from jax.experimental.pallas import tpu as pltpu


def _round_up(x, m):
    return ((x + m - 1) // m) * m


def _pad2d(x, rows, cols):
    r, c = x.shape
    if r == rows and c == cols:
        return x
    return jnp.pad(x, ((0, rows - r), (0, cols - c)))


def _gcn_layer_kernel(adj_ref, h_ref, norm_ref, w_ref, b_ref, out_ref, acc_ref,
                      *, dout_p, apply_relu, concat):
    """One fused GCN layer, tiled over (dst tiles, src reduction tiles).

    Grid axis 0: destination-node tiles ("parallel").
    Grid axis 1: source-node tiles (reduction, last, "arbitrary").

    acc_ref accumulates adj_tile @ h_tile in f32; the last reduction step runs
    the epilogue: norm multiply, dense layer, bias, relu/concat, lane-dense
    padded store.
    """
    k = pl.program_id(1)

    @pl.when(k == 0)
    def _():
        acc_ref[...] = jnp.zeros_like(acc_ref)

    # Message passing + sum over this source tile.
    # Adjacency is exactly {0,1}: the per-tile bf16 cast is lossless and runs
    # on the VPU, hidden under the pipeline (adj is DMA'd in its HBM dtype).
    a = adj_ref[...].astype(jnp.bfloat16)
    h = h_ref[...].astype(jnp.bfloat16)
    acc_ref[...] += jnp.dot(a, h, preferred_element_type=jnp.float32)

    @pl.when(k == pl.num_programs(1) - 1)
    def _():
        # NodeUpdate (eval): h = h * norm   (f32 epilogue on the VPU)
        hn = acc_ref[...] * norm_ref[...]
        # dense layer: h @ W^T + b          (bf16 MXU operands, f32 accumulate)
        z = jnp.dot(hn.astype(jnp.bfloat16), w_ref[...],
                    preferred_element_type=jnp.float32) + b_ref[...]
        if concat:
            # Two 128-aligned slabs: [z | relu(z)], each padded to dout_p.
            out_ref[:, :dout_p] = z.astype(out_ref.dtype)
            out_ref[:, dout_p:] = jnp.maximum(z, 0.0).astype(out_ref.dtype)
        elif apply_relu:
            out_ref[...] = jnp.maximum(z, 0.0).astype(out_ref.dtype)
        else:
            out_ref[...] = z.astype(out_ref.dtype)


def gcn_layer(adj, h, norm, w_t_p, b_p, *, apply_relu, concat, out_dtype,
              tm_target=256, tk_target=512):
    """One pallas_call per GCN layer.

    adj   : [n_dst, n_src]      dense {0,1} block adjacency (any float dtype)
    h     : [rows_h, din_p]     source features in the padded/lane-aligned
                                layout produced by the previous layer
                                (rows_h >= n_src; extra rows are inert)
    norm  : [n_dst]             per-destination normalization (f32)
    w_t_p : [din_p, dout_p]     bf16 transposed Linear weight, rows placed to
                                match the padded input column layout
    b_p   : [1, dout_p]         f32 padded bias

    Returns the padded output [n_dst_p, out_cols_p] in `out_dtype`.
    """
    n_dst, n_src = adj.shape
    rows_h, din_p = h.shape
    w_din_p, dout_p = w_t_p.shape
    assert din_p == w_din_p, (din_p, w_din_p)
    assert rows_h >= n_src, (rows_h, n_src)

    out_cols_p = 2 * dout_p if concat else dout_p

    # Tile sizes clamped to the (padded) problem; arrays padded to tile
    # multiples with zeros (zero src rows / dst rows contribute nothing).
    tm = min(tm_target, _round_up(n_dst, 8))
    n_dst_p = _round_up(n_dst, tm)
    n_src_eff = max(n_src, rows_h)
    tk = min(tk_target, _round_up(n_src_eff, 128))
    n_src_p = _round_up(n_src_eff, tk)

    adj_p = _pad2d(adj, n_dst_p, n_src_p)        # keep dtype; cast per-tile
    h_p = _pad2d(h, n_src_p, din_p)              # usually a no-op between layers
    norm_p = _pad2d(norm.astype(jnp.float32).reshape(n_dst, 1), n_dst_p, 1)

    kernel = functools.partial(_gcn_layer_kernel, dout_p=dout_p,
                               apply_relu=apply_relu, concat=concat)

    return pl.pallas_call(
        kernel,
        out_shape=jax.ShapeDtypeStruct((n_dst_p, out_cols_p), out_dtype),
        grid=(n_dst_p // tm, n_src_p // tk),
        in_specs=[
            pl.BlockSpec((tm, tk),        lambda i, k: (i, k)),   # adjacency tile
            pl.BlockSpec((tk, din_p),     lambda i, k: (k, 0)),   # src feature tile
            pl.BlockSpec((tm, 1),         lambda i, k: (i, 0)),   # norm tile
            pl.BlockSpec((din_p, dout_p), lambda i, k: (0, 0)),   # W^T (whole)
            pl.BlockSpec((1, dout_p),     lambda i, k: (0, 0)),   # bias (whole)
        ],
        out_specs=pl.BlockSpec((tm, out_cols_p), lambda i, k: (i, 0)),
        scratch_shapes=[pltpu.VMEM((tm, din_p), jnp.float32)],
        compiler_params=pltpu.CompilerParams(
            dimension_semantics=("parallel", "arbitrary"),
            vmem_limit_bytes=48 * 1024 * 1024),
    )(adj_p, h_p, norm_p, w_t_p, b_p)


def _build_padded_weight(w_t, b, in_segments, in_width):
    """Place W^T rows so they line up with the padded input column layout."""
    din, dout = w_t.shape
    dout_p = _round_up(dout, 128)
    w_np = np.zeros((in_width, dout_p), np.float32)
    w_src = np.asarray(w_t, np.float32)
    pos = 0
    for off, cnt in in_segments:
        w_np[off:off + cnt, :dout] = w_src[pos:pos + cnt]
        pos += cnt
    assert pos == din, (pos, din)
    b_np = np.zeros((1, dout_p), np.float32)
    b_np[0, :dout] = np.asarray(b, np.float32)
    return jnp.asarray(w_np, jnp.bfloat16), jnp.asarray(b_np, jnp.float32), dout_p


class GCNSamplingPallas:
    """Mirror of the PyTorch GCNSampling layer structure (inference mode)."""

    def __init__(self, in_feats, n_hidden, n_classes, n_layers, key):
        self.n_layers = int(n_layers)

        # Layer dims/flags exactly as in the PyTorch module.
        specs = []
        if self.n_layers == 1:
            specs.append((in_feats, n_classes, True, False))
        else:
            specs.append((in_feats, n_hidden, True, self.n_layers == 2))
            for i in range(2, self.n_layers):
                specs.append((n_hidden, n_hidden, True, i == self.n_layers - 1))
            specs.append((2 * n_hidden, n_classes, False, False))

        keys = jax.random.split(key, len(specs))

        # Column layout of the input to the next layer, as a list of
        # (padded_column_offset, logical_count) segments.
        in_segments = ((0, in_feats),)
        in_width = _round_up(in_feats, 128)
        self.in_width0 = in_width

        self.layers = []
        for (din, dout, relu, concat), k in zip(specs, keys):
            k1, k2 = jax.random.split(k)
            # PyTorch-style uniform init: U(-1/sqrt(din), 1/sqrt(din))
            bound = 1.0 / math.sqrt(din)
            w = jax.random.uniform(k1, (dout, din), jnp.float32, -bound, bound)
            b = jax.random.uniform(k2, (dout,), jnp.float32, -bound, bound)
            w_t = w.T                                           # [din, dout]
            # One-time, layout-aware padding + bf16 cast of the weights.
            w_t_p, b_p, dout_p = _build_padded_weight(w_t, b, in_segments, in_width)
            self.layers.append(dict(w_t=w_t, b=b, w_t_p=w_t_p, b_p=b_p,
                                    dout=dout, dout_p=dout_p, din_p=in_width,
                                    relu=relu, concat=concat))
            if concat:
                in_segments = ((0, dout), (dout_p, dout))
                in_width = 2 * dout_p
            else:
                in_segments = ((0, dout),)
                in_width = dout_p

    # TODO(synk): for very small NodeFlows, fuse all layers into one
    # pallas_call (intermediate h kept in VMEM scratch) to remove per-layer
    # launch + HBM round trips.
    # TODO(synk): for low-fan-out sampling, replace the dense adjacency matmul
    # with a PrefetchScalarGridSpec row-gather of sampled neighbors.
    def forward(self, embed, adjs, norms):
        n0, _ = embed.shape
        # Pad + cast embeddings once; after that h stays in the padded bf16
        # lane-aligned layout until the final layer.
        h = _pad2d(embed, n0, self.in_width0).astype(jnp.bfloat16)
        for i, L in enumerate(self.layers):
            last = i == len(self.layers) - 1
            h = gcn_layer(adjs[i], h, norms[i], L["w_t_p"], L["b_p"],
                          apply_relu=L["relu"], concat=L["concat"],
                          out_dtype=jnp.float32 if last else jnp.bfloat16)
        n_dst = adjs[-1].shape[0]
        return h[:n_dst, :self.layers[-1]["dout"]]

    def reference(self, embed, adjs, norms):
        """Pure-JAX reference using the same bf16-operand / f32-accum math."""
        h = embed
        for i, L in enumerate(self.layers):
            agg = jnp.dot(adjs[i].astype(jnp.bfloat16), h.astype(jnp.bfloat16),
                          preferred_element_type=jnp.float32)
            hn = agg * norms[i][:, None].astype(jnp.float32)
            z = jnp.dot(hn.astype(jnp.bfloat16),
                        L["w_t"].astype(jnp.bfloat16),
                        preferred_element_type=jnp.float32) + L["b"][None, :]
            if L["concat"]:
                h = jnp.concatenate([z, jnp.maximum(z, 0.0)], axis=1)
            elif L["relu"]:
                h = jnp.maximum(z, 0.0)
            else:
                h = z
        return h


if __name__ == "__main__":
    key = jax.random.PRNGKey(0)

    # Small synthetic NodeFlow: 2 blocks, node counts 1024 -> 256 -> 128,
    # enough to exercise the tiled reduction (2 src tiles on layer 1).
    in_feats, n_hidden, n_classes, n_layers = 128, 64, 16, 2
    node_counts = [1024, 256, 128]

    k_embed, k_adj0, k_adj1 = jax.random.split(key, 3)

    embed = jax.random.normal(k_embed, (node_counts[0], in_feats), jnp.float32)

    adjs, norms = [], []
    for li, k_adj in enumerate([k_adj0, k_adj1]):
        n_dst, n_src = node_counts[li + 1], node_counts[li]
        adj = jax.random.bernoulli(k_adj, 0.25, (n_dst, n_src)).astype(jnp.float32)
        deg = adj.sum(axis=1)
        norm = 1.0 / jnp.maximum(deg, 1.0)  # GCN-style 1/in-degree normalization
        adjs.append(adj)
        norms.append(norm)

    model = GCNSamplingPallas(in_feats, n_hidden, n_classes, n_layers,
                              jax.random.PRNGKey(42))

    fwd = jax.jit(model.forward)
    out = jax.block_until_ready(fwd(embed, adjs, norms))

    ref = model.reference(embed, adjs, norms)
    np.testing.assert_allclose(np.asarray(out), np.asarray(ref),
                               rtol=1e-2, atol=1e-3)

    # TODO(synk): training-mode branch (dropout, history subtraction, mean
    # aggregation) is not implemented; only the deterministic eval path is.
    print("KERNEL_OK")
</pallas_src>

<mosaic_0001>
module attributes {stable_mosaic.version = 11 : i64} {
  func.func @_gcn_layer_kernel(%arg0: i32, %arg1: i32, %arg2: memref<256x512xf32, #tpu.memory_space<vmem>>, %arg3: memref<512x128xbf16, #tpu.memory_space<vmem>>, %arg4: memref<256x1xf32, #tpu.memory_space<vmem>>, %arg5: memref<128x128xbf16, #tpu.memory_space<vmem>>, %arg6: memref<1x128xf32, #tpu.memory_space<vmem>>, %arg7: memref<256x256xbf16, #tpu.memory_space<vmem>>, %arg8: memref<256x128xf32, #tpu.memory_space<vmem>>) attributes {dimension_semantics = [#tpu.dimension_semantics<parallel>, #tpu.dimension_semantics<arbitrary>], iteration_bounds = array<i64: 1, 2>, scalar_prefetch = 0 : i64, scratch_operands = 1 : i64, tpu.core_type = #tpu.core_type<tc>, window_params = [{transform_indices = @transform_0, window_bounds = array<i64: 256, 512>}, {transform_indices = @transform_1, window_bounds = array<i64: 512, 128>}, {transform_indices = @transform_2, window_bounds = array<i64: 256, 1>}, {pipeline_mode = #tpu.pipeline_mode<synchronous>, transform_indices = @transform_3, window_bounds = array<i64: 128, 128>}, {pipeline_mode = #tpu.pipeline_mode<synchronous>, transform_indices = @transform_4, window_bounds = array<i64: 1, 128>}, {transform_indices = @transform_5, window_bounds = array<i64: 256, 256>}]} {
    %c0_i32 = arith.constant 0 : i32
    %0 = arith.cmpi eq, %arg1, %c0_i32 : i32
    %1 = arith.extui %0 : i1 to i32
    %c0_i32_0 = arith.constant 0 : i32
    %2 = arith.cmpi ne, %1, %c0_i32_0 : i32
    scf.if %2 {
      %cst_9 = arith.constant 0.000000e+00 : f32
      %13 = vector.broadcast %cst_9 : f32 to vector<256x128xf32>
      %c0_10 = arith.constant 0 : index
      %c0_11 = arith.constant 0 : index
      %14 = vector.load %arg8[%c0_10, %c0_11] : memref<256x128xf32, #tpu.memory_space<vmem>>, vector<256x128xf32>
      tpu.vector_store %arg8[%c0_10, %c0_11], %13 {strides = array<i32>} : memref<256x128xf32, #tpu.memory_space<vmem>>, vector<256x128xf32>,
    } else {
    }
    %c0 = arith.constant 0 : index
    %c0_1 = arith.constant 0 : index
    %3 = vector.load %arg2[%c0, %c0_1] : memref<256x512xf32, #tpu.memory_space<vmem>>, vector<256x512xf32>
    %4 = arith.truncf %3 : vector<256x512xf32> to vector<256x512xbf16>
    %c0_2 = arith.constant 0 : index
    %c0_3 = arith.constant 0 : index
    %5 = vector.load %arg3[%c0_2, %c0_3] : memref<512x128xbf16, #tpu.memory_space<vmem>>, vector<512x128xbf16>
    %c0_4 = arith.constant 0 : index
    %c0_5 = arith.constant 0 : index
    %6 = vector.load %arg8[%c0_4, %c0_5] : memref<256x128xf32, #tpu.memory_space<vmem>>, vector<256x128xf32>
    %cst = arith.constant dense<0.000000e+00> : vector<256x128xf32>
    %7 = tpu.matmul %4, %5, %cst {dimension_numbers = #tpu.dot_dimension_numbers<[1], [0], [0], [1], [0, 0, 1, 1], [], []>} : vector<256x512xbf16>, vector<512x128xbf16>, vector<256x128xf32> -> vector<256x128xf32>
    %8 = arith.addf %6, %7 : vector<256x128xf32>
    %c0_6 = arith.constant 0 : index
    %c0_7 = arith.constant 0 : index
    %9 = vector.load %arg8[%c0_6, %c0_7] : memref<256x128xf32, #tpu.memory_space<vmem>>, vector<256x128xf32>
    tpu.vector_store %arg8[%c0_6, %c0_7], %8 {strides = array<i32>} : memref<256x128xf32, #tpu.memory_space<vmem>>, vector<256x128xf32>,
    %c1_i32 = arith.constant 1 : i32
    %10 = arith.cmpi eq, %arg1, %c1_i32 : i32
    %11 = arith.extui %10 : i1 to i32
    %c0_i32_8 = arith.constant 0 : i32
    %12 = arith.cmpi ne, %11, %c0_i32_8 : i32
    scf.if %12 {
      %c0_9 = arith.constant 0 : index
      %c0_10 = arith.constant 0 : index
      %13 = vector.load %arg8[%c0_9, %c0_10] : memref<256x128xf32, #tpu.memory_space<vmem>>, vector<256x128xf32>
      %c0_11 = arith.constant 0 : index
      %c0_12 = arith.constant 0 : index
      %14 = vector.load %arg4[%c0_11, %c0_12] : memref<256x1xf32, #tpu.memory_space<vmem>>, vector<256x1xf32>
      %15 = vector.broadcast %14 : vector<256x1xf32> to vector<256x128xf32>
      %16 = arith.mulf %13, %15 : vector<256x128xf32>
      %17 = arith.truncf %16 : vector<256x128xf32> to vector<256x128xbf16>
      %c0_13 = arith.constant 0 : index
      %c0_14 = arith.constant 0 : index
      %18 = vector.load %arg5[%c0_13, %c0_14] : memref<128x128xbf16, #tpu.memory_space<vmem>>, vector<128x128xbf16>
      %cst_15 = arith.constant dense<0.000000e+00> : vector<256x128xf32>
      %19 = tpu.matmul %17, %18, %cst_15 {dimension_numbers = #tpu.dot_dimension_numbers<[1], [0], [0], [1], [0, 0, 1, 1], [], []>} : vector<256x128xbf16>, vector<128x128xbf16>, vector<256x128xf32> -> vector<256x128xf32>
      %c0_16 = arith.constant 0 : index
      %c0_17 = arith.constant 0 : index
      %20 = vector.load %arg6[%c0_16, %c0_17] : memref<1x128xf32, #tpu.memory_space<vmem>>, vector<1x128xf32>
      %21 = vector.broadcast %20 : vector<1x128xf32> to vector<256x128xf32>
      %22 = arith.addf %19, %21 : vector<256x128xf32>
      %23 = arith.truncf %22 : vector<256x128xf32> to vector<256x128xbf16>
      %c0_18 = arith.constant 0 : index
      %c0_19 = arith.constant 0 : index
      %24 = vector.load %arg7[%c0_18, %c0_19] : memref<256x256xbf16, #tpu.memory_space<vmem>>, vector<256x128xbf16>
      tpu.vector_store %arg7[%c0_18, %c0_19], %23 {strides = array<i32>} : memref<256x256xbf16, #tpu.memory_space<vmem>>, vector<256x128xbf16>,
      %cst_20 = arith.constant 0.000000e+00 : f32
      %25 = vector.broadcast %cst_20 : f32 to vector<256x128xf32>
      %26 = arith.maximumf %22, %25 : vector<256x128xf32>
      %27 = arith.truncf %26 : vector<256x128xf32> to vector<256x128xbf16>
      %c0_21 = arith.constant 0 : index
      %c128 = arith.constant 128 : index
      %28 = vector.load %arg7[%c0_21, %c128] : memref<256x256xbf16, #tpu.memory_space<vmem>>, vector<256x128xbf16>
      tpu.vector_store %arg7[%c0_21, %c128], %27 {strides = array<i32>} : memref<256x256xbf16, #tpu.memory_space<vmem>>, vector<256x128xbf16>,
    } else {
    }
    return
  }
  func.func @transform_0(%arg0: i32, %arg1: i32) -> (i32, i32) {
    %c0_i32 = arith.constant 0 : i32
    return %arg0, %arg1 : i32, i32
  }
  func.func @transform_1(%arg0: i32, %arg1: i32) -> (i32, i32) {
    %c0_i32 = arith.constant 0 : i32
    %c0_i32_0 = arith.constant 0 : i32
    return %arg1, %c0_i32 : i32, i32
  }
  func.func @transform_2(%arg0: i32, %arg1: i32) -> (i32, i32) {
    %c0_i32 = arith.constant 0 : i32
    %c0_i32_0 = arith.constant 0 : i32
    return %arg0, %c0_i32 : i32, i32
  }
  func.func @transform_3(%arg0: i32, %arg1: i32) -> (i32, i32) {
    %c0_i32 = arith.constant 0 : i32
    %c0_i32_0 = arith.constant 0 : i32
    %c0_i32_1 = arith.constant 0 : i32
    return %c0_i32, %c0_i32_0 : i32, i32
  }
  func.func @transform_4(%arg0: i32, %arg1: i32) -> (i32, i32) {
    %c0_i32 = arith.constant 0 : i32
    %c0_i32_0 = arith.constant 0 : i32
    %c0_i32_1 = arith.constant 0 : i32
    return %c0_i32, %c0_i32_0 : i32, i32
  }
  func.func @transform_5(%arg0: i32, %arg1: i32) -> (i32, i32) {
    %c0_i32 = arith.constant 0 : i32
    %c0_i32_0 = arith.constant 0 : i32
    return %arg0, %c0_i32 : i32, i32
  }
}

module attributes {stable_mosaic.version = 11 : i64} {
  func.func @_gcn_layer_kernel(%arg0: i32, %arg1: i32, %arg2: memref<128x256xf32, #tpu.memory_space<vmem>>, %arg3: memref<256x256xbf16, #tpu.memory_space<vmem>>, %arg4: memref<128x1xf32, #tpu.memory_space<vmem>>, %arg5: memref<256x128xbf16, #tpu.memory_space<vmem>>, %arg6: memref<1x128xf32, #tpu.memory_space<vmem>>, %arg7: memref<128x128xf32, #tpu.memory_space<vmem>>, %arg8: memref<128x256xf32, #tpu.memory_space<vmem>>) attributes {dimension_semantics = [#tpu.dimension_semantics<parallel>, #tpu.dimension_semantics<arbitrary>], iteration_bounds = array<i64: 1, 1>, scalar_prefetch = 0 : i64, scratch_operands = 1 : i64, tpu.core_type = #tpu.core_type<tc>, window_params = [{transform_indices = @transform_0, window_bounds = array<i64: 128, 256>}, {transform_indices = @transform_1, window_bounds = array<i64: 256, 256>}, {transform_indices = @transform_2, window_bounds = array<i64: 128, 1>}, {pipeline_mode = #tpu.pipeline_mode<synchronous>, transform_indices = @transform_3, window_bounds = array<i64: 256, 128>}, {pipeline_mode = #tpu.pipeline_mode<synchronous>, transform_indices = @transform_4, window_bounds = array<i64: 1, 128>}, {transform_indices = @transform_5, window_bounds = array<i64: 128, 128>}]} {
    %c0_i32 = arith.constant 0 : i32
    %0 = arith.cmpi eq, %arg1, %c0_i32 : i32
    %1 = arith.extui %0 : i1 to i32
    %c0_i32_0 = arith.constant 0 : i32
    %2 = arith.cmpi ne, %1, %c0_i32_0 : i32
    scf.if %2 {
      %cst_10 = arith.constant 0.000000e+00 : f32
      %13 = vector.broadcast %cst_10 : f32 to vector<128x256xf32>
      %c0_11 = arith.constant 0 : index
      %c0_12 = arith.constant 0 : index
      %14 = vector.load %arg8[%c0_11, %c0_12] : memref<128x256xf32, #tpu.memory_space<vmem>>, vector<128x256xf32>
      tpu.vector_store %arg8[%c0_11, %c0_12], %13 {strides = array<i32>} : memref<128x256xf32, #tpu.memory_space<vmem>>, vector<128x256xf32>,
    } else {
    }
    %c0 = arith.constant 0 : index
    %c0_1 = arith.constant 0 : index
    %3 = vector.load %arg2[%c0, %c0_1] : memref<128x256xf32, #tpu.memory_space<vmem>>, vector<128x256xf32>
    %4 = arith.truncf %3 : vector<128x256xf32> to vector<128x256xbf16>
    %c0_2 = arith.constant 0 : index
    %c0_3 = arith.constant 0 : index
    %5 = vector.load %arg3[%c0_2, %c0_3] : memref<256x256xbf16, #tpu.memory_space<vmem>>, vector<256x256xbf16>
    %c0_4 = arith.constant 0 : index
    %c0_5 = arith.constant 0 : index
    %6 = vector.load %arg8[%c0_4, %c0_5] : memref<128x256xf32, #tpu.memory_space<vmem>>, vector<128x256xf32>
    %cst = arith.constant dense<0.000000e+00> : vector<128x256xf32>
    %7 = tpu.matmul %4, %5, %cst {dimension_numbers = #tpu.dot_dimension_numbers<[1], [0], [0], [1], [0, 0, 1, 1], [], []>} : vector<128x256xbf16>, vector<256x256xbf16>, vector<128x256xf32> -> vector<128x256xf32>
    %8 = arith.addf %6, %7 : vector<128x256xf32>
    %c0_6 = arith.constant 0 : index
    %c0_7 = arith.constant 0 : index
    %9 = vector.load %arg8[%c0_6, %c0_7] : memref<128x256xf32, #tpu.memory_space<vmem>>, vector<128x256xf32>
    tpu.vector_store %arg8[%c0_6, %c0_7], %8 {strides = array<i32>} : memref<128x256xf32, #tpu.memory_space<vmem>>, vector<128x256xf32>,
    %c0_i32_8 = arith.constant 0 : i32
    %10 = arith.cmpi eq, %arg1, %c0_i32_8 : i32
    %11 = arith.extui %10 : i1 to i32
    %c0_i32_9 = arith.constant 0 : i32
    %12 = arith.cmpi ne, %11, %c0_i32_9 : i32
    scf.if %12 {
      %c0_10 = arith.constant 0 : index
      %c0_11 = arith.constant 0 : index
      %13 = vector.load %arg8[%c0_10, %c0_11] : memref<128x256xf32, #tpu.memory_space<vmem>>, vector<128x256xf32>
      %c0_12 = arith.constant 0 : index
      %c0_13 = arith.constant 0 : index
      %14 = vector.load %arg4[%c0_12, %c0_13] : memref<128x1xf32, #tpu.memory_space<vmem>>, vector<128x1xf32>
      %15 = vector.broadcast %14 : vector<128x1xf32> to vector<128x256xf32>
      %16 = arith.mulf %13, %15 : vector<128x256xf32>
      %17 = arith.truncf %16 : vector<128x256xf32> to vector<128x256xbf16>
      %c0_14 = arith.constant 0 : index
      %c0_15 = arith.constant 0 : index
      %18 = vector.load %arg5[%c0_14, %c0_15] : memref<256x128xbf16, #tpu.memory_space<vmem>>, vector<256x128xbf16>
      %cst_16 = arith.constant dense<0.000000e+00> : vector<128x128xf32>
      %19 = tpu.matmul %17, %18, %cst_16 {dimension_numbers = #tpu.dot_dimension_numbers<[1], [0], [0], [1], [0, 0, 1, 1], [], []>} : vector<128x256xbf16>, vector<256x128xbf16>, vector<128x128xf32> -> vector<128x128xf32>
      %c0_17 = arith.constant 0 : index
      %c0_18 = arith.constant 0 : index
      %20 = vector.load %arg6[%c0_17, %c0_18] : memref<1x128xf32, #tpu.memory_space<vmem>>, vector<1x128xf32>
      %21 = vector.broadcast %20 : vector<1x128xf32> to vector<128x128xf32>
      %22 = arith.addf %19, %21 : vector<128x128xf32>
      %c0_19 = arith.constant 0 : index
      %c0_20 = arith.constant 0 : index
      %23 = vector.load %arg7[%c0_19, %c0_20] : memref<128x128xf32, #tpu.memory_space<vmem>>, vector<128x128xf32>
      tpu.vector_store %arg7[%c0_19, %c0_20], %22 {strides = array<i32>} : memref<128x128xf32, #tpu.memory_space<vmem>>, vector<128x128xf32>,
    } else {
    }
    return
  }
  func.func @transform_0(%arg0: i32, %arg1: i32) -> (i32, i32) {
    %c0_i32 = arith.constant 0 : i32
    return %arg0, %arg1 : i32, i32
  }
  func.func @transform_1(%arg0: i32, %arg1: i32) -> (i32, i32) {
    %c0_i32 = arith.constant 0 : i32
    %c0_i32_0 = arith.constant 0 : i32
    return %arg1, %c0_i32 : i32, i32
  }
  func.func @transform_2(%arg0: i32, %arg1: i32) -> (i32, i32) {
    %c0_i32 = arith.constant 0 : i32
    %c0_i32_0 = arith.constant 0 : i32
    return %arg0, %c0_i32 : i32, i32
  }
  func.func @transform_3(%arg0: i32, %arg1: i32) -> (i32, i32) {
    %c0_i32 = arith.constant 0 : i32
    %c0_i32_0 = arith.constant 0 : i32
    %c0_i32_1 = arith.constant 0 : i32
    return %c0_i32, %c0_i32_0 : i32, i32
  }
  func.func @transform_4(%arg0: i32, %arg1: i32) -> (i32, i32) {
    %c0_i32 = arith.constant 0 : i32
    %c0_i32_0 = arith.constant 0 : i32
    %c0_i32_1 = arith.constant 0 : i32
    return %c0_i32, %c0_i32_0 : i32, i32
  }
  func.func @transform_5(%arg0: i32, %arg1: i32) -> (i32, i32) {
    %c0_i32 = arith.constant 0 : i32
    %c0_i32_0 = arith.constant 0 : i32
    return %arg0, %c0_i32 : i32, i32
  }
}

</mosaic_0001>

<bundles_post_ra>
// kernel: forward.3
= control target key start
LH: loop header
LB: loop body
LE: loop exit
PB: predicated region body
PF: predicated region fallthrough
CT: control target
= control target key end

     0   :  { %v1278_v28 = vmov 0   ;;  %s1879_s1 = inlined_call_operand.vmem [shape: bf16[256,256], index: 1, kind: input, shape index: {}]   ;;  %s1880_s2 = inlined_call_operand.vmem [shape: f32[128,1], index: 2, kind: input, shape index: {}]   ;;  %s1881_s0 = inlined_call_operand.vmem [shape: f32[128,256], index: 0, kind: input, shape index: {}]   ;;  %s1882_s3 = inlined_call_operand.vmem [shape: bf16[256,128], index: 3, kind: input, shape index: {}]   ;;  %s1883_s4 = inlined_call_operand.vmem [shape: f32[1,128], index: 4, kind: input, shape index: {}]   ;;  %s1884_s5 = inlined_call_operand.vmem [shape: f32[128,128], index: 5, kind: output, shape index: {}]  }
   0x1   :  { %v1075_v0 = vld [vmem:[%s1879_s1 + $0x70] sm:$0xf]  ;;  %v1224_v1 = vld [vmem:[%s1879_s1 + $0x74] sm:$0xf0]  ;;  %v1067_v5 = vld [vmem:[%s1879_s1 + $0x60] sm:$0xf]  ;;  %1274 = vset.pattern.permute.xlu0 %v1278_v28  ;;  %1275 = vset.pattern.permute.xlu1 %v1278_v28 }
   0x2   :  { %v1139_v2 = vld [vmem:[%s1879_s1 + $0xf0] sm:$0xf]  ;;  %v1076_v3 = vor.u32 %v1224_v1, %v1075_v0  ;;  %v1240_v4 = vld [vmem:[%s1879_s1 + $0xf4] sm:$0xf0]  ;;  %v1222_v6 = vld [vmem:[%s1879_s1 + $0x64] sm:$0xf0]  ;;  %1276 = vset.pattern.permute.xlu2 %v1278_v28 }
   0x3   :  { %v1140_v7 = vor.u32 %v1240_v4, %v1139_v2  ;;  %v1131_v8 = vld [vmem:[%s1879_s1 + $0xe0] sm:$0xf]  ;;  %v1238_v9 = vld [vmem:[%s1879_s1 + $0xe4] sm:$0xf0]  ;;  %v1068_v10 = vor.u32 %v1222_v6, %v1067_v5  ;;  %v1059_v12 = vld [vmem:[%s1879_s1 + $0x50] sm:$0xf] }
   0x4   :  { %328 = vmatpush.bf16.msra.mxu0 %v1076_v3  ;;  %1257 = vmatpush.bf16.msra.mxu2 %v1076_v3  ;;  %v1132_v11 = vor.u32 %v1238_v9, %v1131_v8  ;;  %v1220_v13 = vld [vmem:[%s1879_s1 + $0x54] sm:$0xf0]  ;;  %v1123_v14 = vld [vmem:[%s1879_s1 + $0xd0] sm:$0xf]  ;;  %v1051_v18 = vld [vmem:[%s1879_s1 + $0x40] sm:$0xf] }
   0x5   :  { %377 = vmatpush.bf16.msra.mxu1 %v1140_v7  ;;  %1265 = vmatpush.bf16.msra.mxu3 %v1140_v7  ;;  %v1236_v15 = vld [vmem:[%s1879_s1 + $0xd4] sm:$0xf0]  ;;  %v1060_v16 = vor.u32 %v1220_v13, %v1059_v12  ;;  %v1218_v19 = vld [vmem:[%s1879_s1 + $0x44] sm:$0xf0]  ;;  %v1115_v20 = vld [vmem:[%s1879_s1 + $0xc0] sm:$0xf] }
   0x6   :  { %v1124_v17 = vor.u32 %v1236_v15, %v1123_v14  ;;  %v1234_v21 = vld [vmem:[%s1879_s1 + $0xc4] sm:$0xf0]  ;;  %v1052_v22 = vor.u32 %v1218_v19, %v1051_v18  ;;  %v1043_v24 = vld [vmem:[%s1879_s1 + $0x30] sm:$0xf]  ;;  %v1216_v25 = vld [vmem:[%s1879_s1 + $0x34] sm:$0xf0] }
   0x7   :  { %v1116_v23 = vor.u32 %v1234_v21, %v1115_v20  ;;  %v1107_v26 = vld [vmem:[%s1879_s1 + $0xb0] sm:$0xf]  ;;  %v1232_v27 = vld [vmem:[%s1879_s1 + $0xb4] sm:$0xf0]  ;;  %v623_v29 = vld [vmem:[%s1880_s2] sm:$0xff]  ;;  %v1044_v30 = vor.u32 %v1216_v25, %v1043_v24 }
   0x8   :  { %329 = vmatpush.bf16.msra.mxu0 %v1068_v10  ;;  %1258 = vmatpush.bf16.msra.mxu2 %v1068_v10  ;;  %v1108_v31 = vor.u32 %v1232_v27, %v1107_v26  ;;  %v1035_v32 = vld [vmem:[%s1879_s1 + $0x20] sm:$0xf]  ;;  %v1214_v33 = vld [vmem:[%s1879_s1 + $0x24] sm:$0xf0]  ;;  %v625_v34 = vld [vmem:[%s1880_s2 + $0x10] sm:$0xff] }
   0x9   :  { %378 = vmatpush.bf16.msra.mxu1 %v1132_v11  ;;  %1266 = vmatpush.bf16.msra.mxu3 %v1132_v11  ;;  %v1099_v35 = vld [vmem:[%s1879_s1 + $0xa0] sm:$0xf]  ;;  %v1230_v36 = vld [vmem:[%s1879_s1 + $0xa4] sm:$0xf0]  ;;  %v1036_v37 = vor.u32 %v1214_v33, %v1035_v32  ;;  %v1027_v39 = vld [vmem:[%s1879_s1 + $0x10] sm:$0xf] }
   0xa   :  { %641 = vperm.xlu0 %1274, %v623_v29   ;;  %651 = vperm.xlu1 %1275, %v625_v34   ;;  %v1100_v38 = vor.u32 %v1230_v36, %v1099_v35  ;;  %v1212_v40 = vld [vmem:[%s1879_s1 + $0x14] sm:$0xf0]  ;;  %v1091_v41 = vld [vmem:[%s1879_s1 + $0x90] sm:$0xf]  ;;  %v624_v43 = vld [vmem:[%s1880_s2 + $0x8] sm:$0xff] }
   0xb   :  { %v1228_v42 = vld [vmem:[%s1879_s1 + $0x94] sm:$0xf0]  ;;  %v1028_v45 = vor.u32 %v1212_v40, %v1027_v39  ;;  %v1019_v46 = vld [vmem:[%s1879_s1] sm:$0xf]  ;;  %v1210_v49 = vld [vmem:[%s1879_s1 + $0x4] sm:$0xf0] }
   0xc   :  { %330 = vmatpush.bf16.msra.mxu0 %v1060_v16  ;;  %1259 = vmatpush.bf16.msra.mxu2 %v1060_v16  ;;  %v626_v44 = vld [vmem:[%s1880_s2 + $0x18] sm:$0xff]  ;;  %v627_v47 = vld [vmem:[%s1880_s2 + $0x20] sm:$0xff]  ;;  %v1092_v48 = vor.u32 %v1228_v42, %v1091_v41  ;;  %v1226_v51 = vld [vmem:[%s1879_s1 + $0x84] sm:$0xf0]  ;;  %v1020_v58 = vor.u32 %v1210_v49, %v1019_v46 }
   0xd   :  { %379 = vmatpush.bf16.msra.mxu1 %v1124_v17  ;;  %1267 = vmatpush.bf16.msra.mxu3 %v1124_v17  ;;  %v1083_v50 = vld [vmem:[%s1879_s1 + $0x80] sm:$0xf]  ;;  %v58_v53 = vld [vmem:[%s1881_s0 + $0x10] sm:$0xff]  ;;  %v1077_v55 = vld [vmem:[%s1879_s1 + $0x78] sm:$0xf0] }
   0xe   :  { %v56_v52 = vld [vmem:[%s1881_s0] sm:$0xff]  ;;  %v1223_v54 = vld [vmem:[%s1879_s1 + $0x74] sm:$0xf]  ;;  %v1141_v57 = vld [vmem:[%s1879_s1 + $0xf8] sm:$0xf0]  ;;  %661 = vperm.xlu2 %1276, %v627_v47   ;;  %v1084_v62 = vor.u32 %v1226_v51, %v1083_v50 }
   0xf   :  { %v1239_v56 = vld [vmem:[%s1879_s1 + $0xf4] sm:$0xf]  ;;  %v72_v59 = vld [vmem:[%s1881_s0 + $0x80] sm:$0xff]  ;;  %v57_v61 = vld [vmem:[%s1881_s0 + $0x8] sm:$0xff]  ;;  %v1080_v2 = vor.u32 %v1223_v54, %v1077_v55  ;;  %v1459_v5 = vpack.c.bf16 %v58_v53, %v56_v52 }
  0x10   :  { %331 = vmatpush.bf16.msra.mxu0 %v1052_v22  ;;  %1260 = vmatpush.bf16.msra.mxu2 %v1052_v22  ;;  %v74_v60 = vld [vmem:[%s1881_s0 + $0x90] sm:$0xff]  ;;  %v59_v63 = vld [vmem:[%s1881_s0 + $0x18] sm:$0xff]  ;;  %v73_v0 = vld [vmem:[%s1881_s0 + $0x88] sm:$0xff]  ;;  %v1144_v3 = vor.u32 %v1239_v56, %v1141_v57 }
  0x11   :  { %380 = vmatpush.bf16.msra.mxu1 %v1116_v23  ;;  %1268 = vmatpush.bf16.msra.mxu3 %v1116_v23  ;;  %v75_v1 = vld [vmem:[%s1881_s0 + $0x98] sm:$0xff]  ;;  %v1221_v4 = vld [vmem:[%s1879_s1 + $0x64] sm:$0xf]  ;;  %v1461_v6 = vpack.c.bf16 %v74_v60, %v72_v59  ;;  %v1069_v7 = vld [vmem:[%s1879_s1 + $0x68] sm:$0xf0]  ;;  %v1472_v10 = vpack.c.bf16 %v59_v63, %v57_v61 }
  0x12   :  { %646 = vperm.xlu0 %1274, %v624_v43   ;;  %656 = vperm.xlu1 %1275, %v626_v44   ;;  %v1237_v8 = vld [vmem:[%s1879_s1 + $0xe4] sm:$0xf]  ;;  %v1133_v9 = vld [vmem:[%s1879_s1 + $0xe8] sm:$0xf0]  ;;  %v1474_v11 = vpack.c.bf16 %v75_v1, %v73_v0  ;;  %v1072_v12 = vor.u32 %v1221_v4, %v1069_v7  ;;  %v1219_v14 = vld [vmem:[%s1879_s1 + $0x54] sm:$0xf] }
  0x13   :  { %v1136_v13 = vor.u32 %v1237_v8, %v1133_v9  ;;  %v629_v15 = vld [vmem:[%s1880_s2 + $0x30] sm:$0xff]  ;;  %v630_v16 = vld [vmem:[%s1880_s2 + $0x38] sm:$0xff]  ;;  %v628_v20 = vld [vmem:[%s1880_s2 + $0x28] sm:$0xff] }
  0x14   :  { %332 = vmatpush.bf16.msra.mxu0 %v1044_v30  ;;  %1261 = vmatpush.bf16.msra.mxu2 %v1044_v30  ;;  %v1061_v17 = vld [vmem:[%s1879_s1 + $0x58] sm:$0xf0]  ;;  %v1235_v18 = vld [vmem:[%s1879_s1 + $0xd4] sm:$0xf]  ;;  %v1217_v23 = vld [vmem:[%s1879_s1 + $0x44] sm:$0xf] }
  0x15   :  { %381 = vmatpush.bf16.msra.mxu1 %v1108_v31  ;;  %1269 = vmatpush.bf16.msra.mxu3 %v1108_v31  ;;  %v1125_v19 = vld [vmem:[%s1879_s1 + $0xd8] sm:$0xf0]  ;;  %v1064_v21 = vor.u32 %v1219_v14, %v1061_v17  ;;  %v1053_v24 = vld [vmem:[%s1879_s1 + $0x48] sm:$0xf0]  ;;  %v1233_v25 = vld [vmem:[%s1879_s1 + $0xc4] sm:$0xf] }
  0x16   :  { %v1128_v22 = vor.u32 %v1235_v18, %v1125_v19  ;;  %v1117_v26 = vld [vmem:[%s1879_s1 + $0xc8] sm:$0xf0]  ;;  %666 = vperm.xlu2 %1276, %v628_v20   ;;  %v60_v27 = vld [vmem:[%s1881_s0 + $0x20] sm:$0xff]  ;;  %v62_v28 = vld [vmem:[%s1881_s0 + $0x30] sm:$0xff]  ;;  %v1056_v30 = vor.u32 %v1217_v23, %v1053_v24 }
  0x17   :  { %v76_v29 = vld [vmem:[%s1881_s0 + $0xa0] sm:$0xff]  ;;  %v1120_v31 = vor.u32 %v1233_v25, %v1117_v26  ;;  %v632_v32 = vld [vmem:[%s1880_s2 + $0x48] sm:$0xff]  ;;  %v1215_v33 = vld [vmem:[%s1879_s1 + $0x34] sm:$0xf]  ;;  %v1561_v47 = vpack.c.bf16 %v62_v28, %v60_v27 }
  0x18   :  { %333 = vmatpush.bf16.msra.mxu0 %v1036_v37  ;;  %1262 = vmatpush.bf16.msra.mxu2 %v1036_v37  ;;  %v633_v34 = vld [vmem:[%s1880_s2 + $0x50] sm:$0xff]  ;;  %v1045_v35 = vld [vmem:[%s1879_s1 + $0x38] sm:$0xf0]  ;;  %v61_v39 = vld [vmem:[%s1881_s0 + $0x28] sm:$0xff] }
  0x19   :  { %382 = vmatpush.bf16.msra.mxu1 %v1100_v38  ;;  %1270 = vmatpush.bf16.msra.mxu3 %v1100_v38  ;;  %v1231_v36 = vld [vmem:[%s1879_s1 + $0xb4] sm:$0xf]  ;;  %v1109_v37 = vld [vmem:[%s1879_s1 + $0xb8] sm:$0xf0]  ;;  %v631_v40 = vld [vmem:[%s1880_s2 + $0x40] sm:$0xff]  ;;  %v1048_v44 = vor.u32 %v1215_v33, %v1045_v35 }
  0x1a   :  { %671 = vperm.xlu0 %1274, %v629_v15   ;;  %676 = vperm.xlu1 %1275, %v630_v16   ;;  %v78_v38 = vld [vmem:[%s1881_s0 + $0xb0] sm:$0xff]  ;;  %v63_v41 = vld [vmem:[%s1881_s0 + $0x38] sm:$0xff]  ;;  %v77_v42 = vld [vmem:[%s1881_s0 + $0xa8] sm:$0xff] }
  0x1b   :  { %v79_v43 = vld [vmem:[%s1881_s0 + $0xb8] sm:$0xff]  ;;  %v1213_v46 = vld [vmem:[%s1879_s1 + $0x24] sm:$0xf]  ;;  %v1037_v49 = vld [vmem:[%s1879_s1 + $0x28] sm:$0xf0]  ;;  %v1574_v52 = vpack.c.bf16 %v63_v41, %v61_v39 }
  0x1c   :  { %334 = vmatpush.bf16.msra.mxu0 %v1028_v45  ;;  %1263 = vmatpush.bf16.msra.mxu2 %v1028_v45  ;;  %v1112_v45 = vor.u32 %v1231_v36, %v1109_v37  ;;  %v1229_v50 = vld [vmem:[%s1879_s1 + $0xa4] sm:$0xf]  ;;  %v1101_v51 = vld [vmem:[%s1879_s1 + $0xa8] sm:$0xf0]  ;;  %v1576_v53 = vpack.c.bf16 %v79_v43, %v77_v42  ;;  %v1040_v54 = vor.u32 %v1213_v46, %v1037_v49  ;;  %v1211_v56 = vld [vmem:[%s1879_s1 + $0x14] sm:$0xf] }
  0x1d   :  { %383 = vmatpush.bf16.msra.mxu1 %v1092_v48  ;;  %1271 = vmatpush.bf16.msra.mxu3 %v1092_v48  ;;  %v1563_v48 = vpack.c.bf16 %v78_v38, %v76_v29  ;;  %v1104_v55 = vor.u32 %v1229_v50, %v1101_v51  ;;  %v1029_v57 = vld [vmem:[%s1879_s1 + $0x18] sm:$0xf0]  ;;  %v635_v60 = vld [vmem:[%s1880_s2 + $0x60] sm:$0xff]  ;;  %v1021_v0 = vld [vmem:[%s1879_s1 + $0x8] sm:$0xf0] }
  0x1e   :  { %681 = vperm.xlu2 %1276, %v631_v40   ;;  %v1093_v59 = vld [vmem:[%s1879_s1 + $0x98] sm:$0xf0]  ;;  %v1032_v61 = vor.u32 %v1211_v56, %v1029_v57  ;;  %v1209_v63 = vld [vmem:[%s1879_s1 + $0x4] sm:$0xf]  ;;  %v66_v9 = vld [vmem:[%s1881_s0 + $0x50] sm:$0xff] }
  0x1f   :  { %v1225_v1 = vld [vmem:[%s1879_s1 + $0x84] sm:$0xf]  ;;  %v1024_v4 = vor.u32 %v1209_v63, %v1021_v0  ;;  %v65_v14 = vld [vmem:[%s1881_s0 + $0x48] sm:$0xff]  ;;  %v67_v15 = vld [vmem:[%s1881_s0 + $0x58] sm:$0xff] }
  0x20   :  { %335 = vmatpush.bf16.msra.mxu0 %v1020_v58  ;;  %1264 = vmatpush.bf16.msra.mxu2 %v1020_v58  ;;  %v1227_v58 = vld [vmem:[%s1879_s1 + $0x94] sm:$0xf]  ;;  %v64_v8 = vld [vmem:[%s1881_s0 + $0x40] sm:$0xff]  ;;  %v81_v16 = vld [vmem:[%s1881_s0 + $0xc8] sm:$0xff]  ;;  %v93_v20 = vpack.c.bf16 %v67_v15, %v65_v14 }
  0x21   :  { %384 = vmatpush.bf16.msra.mxu1 %v1084_v62  ;;  %1272 = vmatpush.bf16.msra.mxu3 %v1084_v62  ;;  %v1096_v62 = vor.u32 %v1227_v58, %v1093_v59  ;;  %v83_v17 = vld [vmem:[%s1881_s0 + $0xd8] sm:$0xff]  ;;  %v92_v18 = vpack.c.bf16 %v66_v9, %v64_v8  ;;  %v68_v24 = vld [vmem:[%s1881_s0 + $0x60] sm:$0xff]  ;;  %v70_v25 = vld [vmem:[%s1881_s0 + $0x70] sm:$0xff] }
  0x22   :  { %686 = vperm.xlu0 %1274, %v632_v32   ;;  %691 = vperm.xlu1 %1275, %v633_v34   ;;  %v638_v23 = vld [vmem:[%s1880_s2 + $0x78] sm:$0xff]  ;;  %v84_v26 = vld [vmem:[%s1881_s0 + $0xe0] sm:$0xff]  ;;  %v86_v27 = vld [vmem:[%s1881_s0 + $0xf0] sm:$0xff]  ;;  %v94_v32 = vpack.c.bf16 %v70_v25, %v68_v24 }
  0x23   :  { %336 = vmatmul.bf16.vlgmr.msra.gmra.mxu0 %v1459_v5  ;;  %356 = vmatmul.bf16.vlgmr.msra.gmra.mxu2 %v1461_v6  ;;  %v69_v28 = vld [vmem:[%s1881_s0 + $0x68] sm:$0xff]  ;;  %v71_v29 = vld [vmem:[%s1881_s0 + $0x78] sm:$0xff]  ;;  %v1672_v33 = vpack.c.bf16 %v86_v27, %v84_v26  ;;  %v637_v36 = vld [vmem:[%s1880_s2 + $0x70] sm:$0xff] }
  0x24   :  { %426 = vmatpush.bf16.msrb.mxu2 %v1080_v2  ;;  %385 = vmatmul.bf16.vlgmr.msra.gmra.mxu1 %v1472_v10  ;;  %v1085_v2 = vld [vmem:[%s1879_s1 + $0x88] sm:$0xf0]  ;;  %v95_v34 = vpack.c.bf16 %v71_v29, %v69_v28  ;;  %v1248_v37 = vld [vmem:[%s1882_s3 + $0x38] sm:$0xff]  ;;  %v1247_v38 = vld [vmem:[%s1882_s3 + $0x30] sm:$0xff] }
  0x25   :  { %475 = vmatpush.bf16.msrb.mxu3 %v1144_v3  ;;  %v636_v3 = vld [vmem:[%s1880_s2 + $0x68] sm:$0xff]  ;;  %v1088_v7 = vor.u32 %v1225_v1, %v1085_v2  ;;  %899 = vmatpush.bf16.msrb.mxu0 %v1248_v37  ;;  %v1244_v39 = vld [vmem:[%s1882_s3 + $0x18] sm:$0xff]  ;;  %v1243_v40 = vld [vmem:[%s1882_s3 + $0x10] sm:$0xff] }
  0x26   :  { %405 = vmatmul.bf16.vlgmr.msra.gmra.mxu3 %v1474_v11  ;;  %v1242_v41 = vld [vmem:[%s1882_s3 + $0x8] sm:$0xff]  ;;  %v1241_v42 = vld [vmem:[%s1882_s3] sm:$0xff]  ;;  %v1256_v43 = vld [vmem:[%s1882_s3 + $0x78] sm:$0xff] }
  0x27   :  { %948 = vmatpush.bf16.msrb.mxu1 %v1256_v43  ;;  %v1254_v49 = vld [vmem:[%s1882_s3 + $0x68] sm:$0xff]  ;;  %v1252_v2 = vld [vmem:[%s1882_s3 + $0x58] sm:$0xff] }
  0x28   :  { %427 = vmatpush.bf16.msrb.mxu2 %v1072_v12  ;;  %v80_v12 = vld [vmem:[%s1881_s0 + $0xc0] sm:$0xff]  ;;  %v1250_v24 = vld [vmem:[%s1882_s3 + $0x48] sm:$0xff] }
  0x29   :  { %476 = vmatpush.bf16.msrb.mxu3 %v1136_v13  ;;  %v82_v13 = vld [vmem:[%s1881_s0 + $0xd0] sm:$0xff]  ;;  %900 = vmatpush.bf16.msrb.mxu0 %v1247_v38 }
  0x2a   :  { %701 = vperm.xlu0 %1274, %v635_v60   ;;  %706 = vperm.xlu1 %1275, %v636_v3   ;;  %v1636_v19 = vpack.c.bf16 %v82_v13, %v80_v12 }
  0x2c   :  { %428 = vmatpush.bf16.msrb.mxu2 %v1064_v21  ;;  %v1638_v21 = vpack.c.bf16 %v83_v17, %v81_v16 }
  0x2d   :  { %477 = vmatpush.bf16.msrb.mxu3 %v1128_v22  ;;  %v634_v22 = vld [vmem:[%s1880_s2 + $0x58] sm:$0xff] }
  0x2e   :  { %696 = vperm.xlu2 %1276, %v634_v22  }
  0x30   :  { %429 = vmatpush.bf16.msrb.mxu2 %v1056_v30  ;;  %v85_v30 = vld [vmem:[%s1881_s0 + $0xe8] sm:$0xff] }
  0x31   :  { %478 = vmatpush.bf16.msrb.mxu3 %v1120_v31  ;;  %v87_v31 = vld [vmem:[%s1881_s0 + $0xf8] sm:$0xff] }
  0x32   :  { %716 = vperm.xlu0 %1274, %v638_v23   ;;  %v1674_v35 = vpack.c.bf16 %v87_v31, %v85_v30 }
  0x33   :  { %341 = vmatmul.bf16.gmra.mxu0 %v1561_v47  ;;  %361 = vmatmul.bf16.gmra.mxu2 %v1563_v48 }
  0x34   :  { %430 = vmatpush.bf16.msrb.mxu2 %v1048_v44  ;;  %390 = vmatmul.bf16.gmra.mxu1 %v1574_v52  ;;  %v1255_v44 = vld [vmem:[%s1882_s3 + $0x70] sm:$0xff] }
  0x35   :  { %479 = vmatpush.bf16.msrb.mxu3 %v1112_v45  ;;  %949 = vmatpush.bf16.msrb.mxu1 %v1255_v44 }
  0x36   :  { %410 = vmatmul.bf16.gmra.mxu3 %v1576_v53  ;;  %711 = vperm.xlu2 %1276, %v637_v36  }
  0x38   :  { %431 = vmatpush.bf16.msrb.mxu2 %v1040_v54 }
  0x39   :  { %480 = vmatpush.bf16.msrb.mxu3 %v1104_v55  ;;  %950 = vmatpush.bf16.msrb.mxu1 %v1254_v49 }
  0x3c   :  { %432 = vmatpush.bf16.msrb.mxu2 %v1032_v61 }
  0x3d   :  { %481 = vmatpush.bf16.msrb.mxu3 %v1096_v62 }
  0x40   :  { %433 = vmatpush.bf16.msrb.mxu2 %v1024_v4 }
  0x41   :  { %482 = vmatpush.bf16.msrb.mxu3 %v1088_v7 }
  0x43   :  { %346 = vmatmul.bf16.gmra.mxu0 %v92_v18  ;;  %366 = vmatmul.bf16.gmra.mxu2 %v1636_v19 }
  0x44   :  { %395 = vmatmul.bf16.gmra.mxu1 %v93_v20 }
  0x46   :  { %415 = vmatmul.bf16.gmra.mxu3 %v1638_v21 }
  0x53   :  { %351 = vmatmul.bf16.gmra.mxu0 %v94_v32  ;;  %371 = vmatmul.bf16.gmra.mxu2 %v1672_v33 }
  0x54   :  { %400 = vmatmul.bf16.gmra.mxu1 %v95_v34 }
  0x56   :  { %420 = vmatmul.bf16.gmra.mxu3 %v1674_v35 }
  0x63   :  { %434 = vmatmul.bf16.vlgmr.msrb.gmra.mxu2 %v1459_v5  ;;  %v1246_v5 = vld [vmem:[%s1882_s3 + $0x28] sm:$0xff] }
  0x64   :  { %901 = vmatpush.bf16.msrb.mxu0 %v1246_v5 }
  0x66   :  { %483 = vmatmul.bf16.vlgmr.msrb.gmra.mxu3 %v1472_v10  ;;  %v1245_v10 = vld [vmem:[%s1882_s3 + $0x20] sm:$0xff] }
  0x68   :  { %902 = vmatpush.bf16.msrb.mxu0 %v1245_v10  ;;  %v1753_v22 = vpop.permute.xlu2 %661 }
  0x6c   :  { %903 = vmatpush.bf16.msrb.mxu0 %v1244_v39 }
  0x70   :  { %904 = vmatpush.bf16.msrb.mxu0 %v1243_v40  ;;  %v1766_v36 = vpop.permute.xlu2 %666 }
  0x73   :  { %439 = vmatmul.bf16.gmra.mxu2 %v1561_v47 }
  0x74   :  { %905 = vmatpush.bf16.msrb.mxu0 %v1242_v41 }
  0x76   :  { %488 = vmatmul.bf16.gmra.mxu3 %v1574_v52 }
  0x78   :  { %906 = vmatpush.bf16.msrb.mxu0 %v1241_v42 }
  0x7c   :  { %v1715_v46 = vpop.permute.xlu0 %641  ;;  %v1735_v0 = vpop.permute.xlu1 %651 }
  0x83   :  { %444 = vmatmul.bf16.gmra.mxu2 %v92_v18 }
  0x84   :  { %v1725_v59 = vpop.permute.xlu0 %646  ;;  %v1745_v15 = vpop.permute.xlu1 %656 }
  0x86   :  { %493 = vmatmul.bf16.gmra.mxu3 %v93_v20 }
  0x8c   :  { %v1773_v44 = vpop.permute.xlu0 %671 }
  0x93   :  { %449 = vmatmul.bf16.gmra.mxu2 %v94_v32 }
  0x96   :  { %498 = vmatmul.bf16.gmra.mxu3 %v95_v34  ;;  %v1249_v34 = vld [vmem:[%s1882_s3 + $0x40] sm:$0xff] }
  0xa0   :  { %v337_v45 = vpop.f32.mrf.mxu0 }
  0xa1   :  { %v386_v47 = vpop.f32.mrf.mxu1 }
  0xa2   :  { %v387_v50 = vadd.f32 %v386_v47, %v337_v45 }
  0xa3   :  { %454 = vmatmul.bf16.gmra.mxu2 %v1461_v6 }
  0xa4   :  { %v719_v57 = vmul.f32 %v1715_v46, %v387_v50  ;;  %v1776_v50 = vpop.permute.xlu1 %676 }
  0xa6   :  { %503 = vmatmul.bf16.gmra.mxu3 %v1474_v11  ;;  %v357_v51 = vpop.f32.mrf.mxu2  ;;  %v1253_v11 = vld [vmem:[%s1882_s3 + $0x60] sm:$0xff] }
  0xa7   :  { %951 = vmatpush.bf16.msrb.mxu1 %v1253_v11 }
  0xa8   :  { %v339_v55 = vpop.f32.mrf.mxu0 }
  0xa9   :  { %v406_v52 = vpop.f32.mrf.mxu3  ;;  %v388_v56 = vpop.f32.mrf.mxu1 }
  0xaa   :  { %v1722_v54 = vadd.f32 %v406_v52, %v357_v51  ;;  %v389_v58 = vadd.f32 %v388_v56, %v339_v55 }
  0xab   :  { %952 = vmatpush.bf16.msrb.mxu1 %v1252_v2 }
  0xac   :  { %v721_v6 = vmul.f32 %v1725_v59, %v389_v58 }
  0xae   :  { %v1731_v60 = vpop.f32.mrf.mxu2  ;;  %v751_v61 = vpack.c.bf16 %v721_v6, %v719_v57  ;;  %v1781_v57 = vpop.permute.xlu0 %686 }
  0xaf   :  { %v1783_v6 = vpop.permute.xlu2 %681 }
  0xb0   :  { %907 = vmatmul.bf16.vlgmr.msrb.gmra.mxu0 %v751_v61  ;;  %v342_v63 = vpop.f32.mrf.mxu0  ;;  %v735_v61 = vmul.f32 %v1783_v6, %v1722_v54 }
  0xb1   :  { %v1733_v62 = vpop.f32.mrf.mxu3  ;;  %v391_v1 = vpop.f32.mrf.mxu1 }
  0xb2   :  { %v392_v3 = vadd.f32 %v391_v1, %v342_v63 }
  0xb3   :  { %459 = vmatmul.bf16.gmra.mxu2 %v1563_v48 }
  0xb4   :  { %v723_v13 = vmul.f32 %v1735_v0, %v392_v3 }
  0xb6   :  { %508 = vmatmul.bf16.gmra.mxu3 %v1576_v53  ;;  %v362_v4 = vpop.f32.mrf.mxu2  ;;  %v1251_v53 = vld [vmem:[%s1882_s3 + $0x50] sm:$0xff] }
  0xb7   :  { %953 = vmatpush.bf16.msrb.mxu1 %v1251_v53 }
  0xb8   :  { %v344_v9 = vpop.f32.mrf.mxu0 }
  0xb9   :  { %v411_v7 = vpop.f32.mrf.mxu3  ;;  %v393_v12 = vpop.f32.mrf.mxu1 }
  0xba   :  { %v1742_v8 = vadd.f32 %v411_v7, %v362_v4  ;;  %v394_v14 = vadd.f32 %v393_v12, %v344_v9 }
  0xbb   :  { %954 = vmatpush.bf16.msrb.mxu1 %v1250_v24 }
  0xbc   :  { %v725_v48 = vmul.f32 %v1745_v15, %v394_v14 }
  0xbe   :  { %v1751_v16 = vpop.f32.mrf.mxu2  ;;  %v753_v17 = vpack.c.bf16 %v725_v48, %v723_v13  ;;  %v1791_v13 = vpop.permute.xlu2 %696 }
  0xbf   :  { %955 = vmatpush.bf16.msrb.mxu1 %v1249_v34  ;;  %v1793_v48 = vpop.permute.xlu1 %691 }
  0xc0   :  { %912 = vmatmul.bf16.gmra.mxu0 %v753_v17  ;;  %v347_v20 = vpop.f32.mrf.mxu0  ;;  %v739_v53 = vmul.f32 %v1793_v48, %v1742_v8 }
  0xc1   :  { %v413_v18 = vpop.f32.mrf.mxu3  ;;  %v396_v23 = vpop.f32.mrf.mxu1 }
  0xc2   :  { %v397_v25 = vadd.f32 %v396_v23, %v347_v20  ;;  %v414_v9 = vadd.f32 %v413_v18, %v1751_v16 }
  0xc3   :  { %464 = vmatmul.bf16.gmra.mxu2 %v1636_v19 }
  0xc4   :  { %v727_v31 = vmul.f32 %v1753_v22, %v397_v25  ;;  %v741_v54 = vmul.f32 %v1791_v13, %v414_v9 }
  0xc6   :  { %513 = vmatmul.bf16.gmra.mxu3 %v1638_v21  ;;  %v367_v26 = vpop.f32.mrf.mxu2 }
  0xc8   :  { %v349_v29 = vpop.f32.mrf.mxu0 }
  0xc9   :  { %v416_v27 = vpop.f32.mrf.mxu3  ;;  %v398_v30 = vpop.f32.mrf.mxu1 }
  0xca   :  { %v1760_v28 = vadd.f32 %v416_v27, %v367_v26  ;;  %v399_v32 = vadd.f32 %v398_v30, %v349_v29  ;;  %v707_v27 = vpop.permute.xlu1 %706  ;;  %v702_v30 = vpop.permute.xlu0 %701 }
  0xcc   :  { %v729_v19 = vmul.f32 %v1766_v36, %v399_v32  ;;  %v743_v8 = vmul.f32 %v702_v30, %v1760_v28 }
  0xce   :  { %v369_v21 = vpop.f32.mrf.mxu2  ;;  %v755_v37 = vpack.c.bf16 %v729_v19, %v727_v31 }
  0xd0   :  { %917 = vmatmul.bf16.gmra.mxu0 %v755_v37  ;;  %v352_v5 = vpop.f32.mrf.mxu0 }
  0xd1   :  { %v418_v38 = vpop.f32.mrf.mxu3  ;;  %v401_v10 = vpop.f32.mrf.mxu1 }
  0xd2   :  { %v402_v39 = vadd.f32 %v401_v10, %v352_v5  ;;  %v419_v25 = vadd.f32 %v418_v38, %v369_v21 }
  0xd3   :  { %469 = vmatmul.bf16.gmra.mxu2 %v1672_v33 }
  0xd4   :  { %v731_v47 = vmul.f32 %v1773_v44, %v402_v39  ;;  %v745_v31 = vmul.f32 %v707_v27, %v419_v25  ;;  %v717_v39 = vpop.permute.xlu0 %716 }
  0xd6   :  { %518 = vmatmul.bf16.gmra.mxu3 %v1674_v35  ;;  %v372_v40 = vpop.f32.mrf.mxu2  ;;  %v409_v35 = vadd.f32 %v1733_v62, %v1731_v60  ;;  %v763_v19 = vpack.c.bf16 %v745_v31, %v743_v8 }
  0xd8   :  { %v354_v43 = vpop.f32.mrf.mxu0  ;;  %v737_v11 = vmul.f32 %v1781_v57, %v409_v35 }
  0xd9   :  { %v421_v41 = vpop.f32.mrf.mxu3  ;;  %v403_v45 = vpop.f32.mrf.mxu1 }
  0xda   :  { %v1771_v42 = vadd.f32 %v421_v41, %v372_v40  ;;  %v404_v49 = vadd.f32 %v403_v45, %v354_v43  ;;  %v759_v2 = vpack.c.bf16 %v737_v11, %v735_v61  ;;  %v712_v41 = vpop.permute.xlu2 %711 }
  0xdc   :  { %v733_v51 = vmul.f32 %v1776_v50, %v404_v49  ;;  %v747_v28 = vmul.f32 %v712_v41, %v1771_v42 }
  0xde   :  { %v374_v52 = vpop.f32.mrf.mxu2  ;;  %v757_v33 = vpack.c.bf16 %v733_v51, %v731_v47 }
  0xe0   :  { %922 = vmatmul.bf16.gmra.mxu0 %v757_v33 }
  0xe1   :  { %v423_v55 = vpop.f32.mrf.mxu3 }
  0xe2   :  { %v424_v21 = vadd.f32 %v423_v55, %v374_v52 }
  0xe4   :  { %v749_v43 = vmul.f32 %v717_v39, %v424_v21 }
  0xe6   :  { %v435_v56 = vpop.f32.mrf.mxu2  ;;  %v765_v49 = vpack.c.bf16 %v749_v43, %v747_v28 }
  0xe9   :  { %v484_v58 = vpop.f32.mrf.mxu3 }
  0xea   :  { %v485_v63 = vadd.f32 %v484_v58, %v435_v56 }
  0xec   :  { %v720_v7 = vmul.f32 %v1715_v46, %v485_v63  ;;  %v761_v46 = vpack.c.bf16 %v741_v54, %v739_v53 }
  0xee   :  { %v437_v1 = vpop.f32.mrf.mxu2 }
  0xf0   :  { %927 = vmatmul.bf16.gmra.mxu0 %v759_v2 }
  0xf1   :  { %v486_v3 = vpop.f32.mrf.mxu3 }
  0xf2   :  { %v487_v4 = vadd.f32 %v486_v3, %v437_v1 }
  0xf4   :  { %v722_v60 = vmul.f32 %v1725_v59, %v487_v4 }
  0xf6   :  { %v752_v62 = vpack.c.bf16 %v722_v60, %v720_v7  ;;  %v440_v12 = vpop.f32.mrf.mxu2 }
  0xf8   :  { %956 = vmatmul.bf16.vlgmr.msrb.gmra.mxu1 %v752_v62 }
  0xf9   :  { %v489_v14 = vpop.f32.mrf.mxu3 }
  0xfa   :  { %v490_v17 = vadd.f32 %v489_v14, %v440_v12 }
  0xfc   :  { %v724_v16 = vmul.f32 %v1735_v0, %v490_v17 }
  0xfe   :  { %v442_v20 = vpop.f32.mrf.mxu2 }
 0x100   :  { %932 = vmatmul.bf16.gmra.mxu0 %v761_v46 }
 0x101   :  { %v491_v23 = vpop.f32.mrf.mxu3 }
 0x102   :  { %v492_v59 = vadd.f32 %v491_v23, %v442_v20 }
 0x104   :  { %v726_v18 = vmul.f32 %v1745_v15, %v492_v59 }
 0x106   :  { %v754_v24 = vpack.c.bf16 %v726_v18, %v724_v16  ;;  %v445_v26 = vpop.f32.mrf.mxu2 }
 0x108   :  { %961 = vmatmul.bf16.gmra.mxu1 %v754_v24 }
 0x109   :  { %v494_v29 = vpop.f32.mrf.mxu3 }
 0x10a   :  { %v495_v32 = vadd.f32 %v494_v29, %v445_v26 }
 0x10c   :  { %v728_v0 = vmul.f32 %v1753_v22, %v495_v32  ;;  %v1813_v32 = vld [vmem:[%s1883_s4] ss:$0 sm:$0xff] }
 0x10e   :  { %v447_v34 = vpop.f32.mrf.mxu2 }
 0x110   :  { %937 = vmatmul.bf16.gmra.mxu0 %v763_v19 }
 0x111   :  { %v496_v37 = vpop.f32.mrf.mxu3 }
 0x112   :  { %v497_v5 = vadd.f32 %v496_v37, %v447_v34 }
 0x114   :  { %v730_v15 = vmul.f32 %v1766_v36, %v497_v5 }
 0x116   :  { %v756_v10 = vpack.c.bf16 %v730_v15, %v728_v0  ;;  %v450_v38 = vpop.f32.mrf.mxu2 }
 0x118   :  { %966 = vmatmul.bf16.gmra.mxu1 %v756_v10 }
 0x119   :  { %v499_v40 = vpop.f32.mrf.mxu3 }
 0x11a   :  { %v500_v45 = vadd.f32 %v499_v40, %v450_v38 }
 0x11c   :  { %v732_v22 = vmul.f32 %v1773_v44, %v500_v45 }
 0x11e   :  { %v452_v47 = vpop.f32.mrf.mxu2 }
 0x120   :  { %942 = vmatmul.bf16.gmra.mxu0 %v765_v49 }
 0x121   :  { %v501_v51 = vpop.f32.mrf.mxu3 }
 0x122   :  { %v502_v33 = vadd.f32 %v501_v51, %v452_v47 }
 0x124   :  { %v734_v36 = vmul.f32 %v1776_v50, %v502_v33 }
 0x126   :  { %v758_v35 = vpack.c.bf16 %v734_v36, %v732_v22  ;;  %v455_v52 = vpop.f32.mrf.mxu2 }
 0x128   :  { %971 = vmatmul.bf16.gmra.mxu1 %v758_v35 }
 0x129   :  { %v504_v55 = vpop.f32.mrf.mxu3 }
 0x12a   :  { %v505_v56 = vadd.f32 %v504_v55, %v455_v52 }
 0x12c   :  { %v736_v42 = vmul.f32 %v1783_v6, %v505_v56 }
 0x12d   :  { %v908_v17 = vpop.f32.mrf.mxu0 }
 0x12e   :  { %v457_v58 = vpop.f32.mrf.mxu2 }
 0x131   :  { %v506_v11 = vpop.f32.mrf.mxu3 }
 0x132   :  { %v507_v61 = vadd.f32 %v506_v11, %v457_v58 }
 0x134   :  { %v738_v63 = vmul.f32 %v1781_v57, %v507_v61 }
 0x135   :  { %v910_v18 = vpop.f32.mrf.mxu0 }
 0x136   :  { %v760_v1 = vpack.c.bf16 %v738_v63, %v736_v42  ;;  %v460_v2 = vpop.f32.mrf.mxu2  ;;  %v911_v5 = vadd.f32 %v1813_v32, %v910_v18 }
 0x138   :  { %976 = vmatmul.bf16.gmra.mxu1 %v760_v1 }
 0x139   :  { %v509_v3 = vpop.f32.mrf.mxu3 }
 0x13a   :  { %v510_v4 = vadd.f32 %v509_v3, %v460_v2 }
 0x13c   :  { %v740_v60 = vmul.f32 %v1793_v48, %v510_v4 }
 0x13d   :  { %v913_v8 = vpop.f32.mrf.mxu0 }
 0x13e   :  { %v462_v44 = vpop.f32.mrf.mxu2  ;;  %v914_v10 = vadd.f32 %v1813_v32, %v913_v8 }
 0x141   :  { %v511_v7 = vpop.f32.mrf.mxu3 }
 0x142   :  { %v512_v50 = vadd.f32 %v511_v7, %v462_v44 }
 0x144   :  { %v742_v62 = vmul.f32 %v1791_v13, %v512_v50 }
 0x146   :  { %v762_v9 = vpack.c.bf16 %v742_v62, %v740_v60  ;;  %v465_v12 = vpop.f32.mrf.mxu2 }
 0x148   :  { %981 = vmatmul.bf16.gmra.mxu1 %v762_v9 }
 0x149   :  { %v514_v14 = vpop.f32.mrf.mxu3 }
 0x14a   :  { %v515_v54 = vadd.f32 %v514_v14, %v465_v12 }
 0x14c   :  { %v744_v20 = vmul.f32 %v702_v30, %v515_v54  ;;  %v909_v30 = vadd.f32 %v1813_v32, %v908_v17 }
 0x14e   :  { %v467_v6 = vpop.f32.mrf.mxu2 }
 0x151   :  { %v516_v53 = vpop.f32.mrf.mxu3 }
 0x152   :  { %v517_v57 = vadd.f32 %v516_v53, %v467_v6 }
 0x154   :  { %v746_v46 = vmul.f32 %v707_v27, %v517_v57  ;;  %v915_v27 = vpop.f32.mrf.mxu0 }
 0x155   :  { %v916_v40 = vadd.f32 %v1813_v32, %v915_v27 }
 0x156   :  { %v764_v23 = vpack.c.bf16 %v746_v46, %v744_v20  ;;  %v470_v59 = vpop.f32.mrf.mxu2 }
 0x158   :  { %986 = vmatmul.bf16.gmra.mxu1 %v764_v23 }
 0x159   :  { %v519_v16 = vpop.f32.mrf.mxu3 }
 0x15a   :  { %v520_v24 = vadd.f32 %v519_v16, %v470_v59 }
 0x15c   :  { %v748_v26 = vmul.f32 %v712_v41, %v520_v24  ;;  %v918_v37 = vpop.f32.mrf.mxu0 }
 0x15d   :  { %v919_v45 = vadd.f32 %v1813_v32, %v918_v37 }
 0x15e   :  { %v472_v48 = vpop.f32.mrf.mxu2 }
 0x161   :  { %v521_v25 = vpop.f32.mrf.mxu3 }
 0x162   :  { %v522_v13 = vadd.f32 %v521_v25, %v472_v48 }
 0x164   :  { %v750_v29 = vmul.f32 %v717_v39, %v522_v13  ;;  %v920_v21 = vpop.f32.mrf.mxu0 }
 0x165   :  { %v921_v33 = vadd.f32 %v1813_v32, %v920_v21 }
 0x166   :  { %v766_v31 = vpack.c.bf16 %v750_v29, %v748_v26 }
 0x168   :  { %991 = vmatmul.bf16.gmra.mxu1 %v766_v31 }
 0x16c   :  { %v923_v28 = vpop.f32.mrf.mxu0 }
 0x16d   :  { %v924_v52 = vadd.f32 %v1813_v32, %v923_v28 }
 0x174   :  { %v925_v51 = vpop.f32.mrf.mxu0 }
 0x175   :  { %v957_v34 = vpop.f32.mrf.mxu1  ;;  %v926_v58 = vadd.f32 %v1813_v32, %v925_v51 }
 0x176   :  { %v958_v19 = vadd.f32 %v957_v34, %v909_v30 }
 0x178   :  { %997 = vst [vmem:[%s1884_s5] sm:$0xff] %v958_v19 }
 0x17c   :  { %v928_v35 = vpop.f32.mrf.mxu0 }
 0x17d   :  { %v959_v0 = vpop.f32.mrf.mxu1  ;;  %v929_v63 = vadd.f32 %v1813_v32, %v928_v35 }
 0x17e   :  { %v960_v15 = vadd.f32 %v959_v0, %v911_v5 }
 0x180   :  { %998 = vst [vmem:[%s1884_s5 + $0x8] sm:$0xff] %v960_v15 }
 0x184   :  { %v930_v11 = vpop.f32.mrf.mxu0 }
 0x185   :  { %v962_v38 = vpop.f32.mrf.mxu1  ;;  %v931_v4 = vadd.f32 %v1813_v32, %v930_v11 }
 0x186   :  { %v963_v39 = vadd.f32 %v962_v38, %v914_v10 }
 0x188   :  { %999 = vst [vmem:[%s1884_s5 + $0x10] sm:$0xff] %v963_v39 }
 0x18c   :  { %v933_v3 = vpop.f32.mrf.mxu0 }
 0x18d   :  { %v964_v41 = vpop.f32.mrf.mxu1  ;;  %v934_v60 = vadd.f32 %v1813_v32, %v933_v3 }
 0x18e   :  { %v965_v43 = vadd.f32 %v964_v41, %v916_v40 }
 0x190   :  { %1000 = vst [vmem:[%s1884_s5 + $0x18] sm:$0xff] %v965_v43 }
 0x194   :  { %v935_v50 = vpop.f32.mrf.mxu0 }
 0x195   :  { %v967_v47 = vpop.f32.mrf.mxu1  ;;  %v936_v14 = vadd.f32 %v1813_v32, %v935_v50 }
 0x196   :  { %v968_v49 = vadd.f32 %v967_v47, %v919_v45 }
 0x198   :  { %1001 = vst [vmem:[%s1884_s5 + $0x20] sm:$0xff] %v968_v49 }
 0x19c   :  { %v938_v12 = vpop.f32.mrf.mxu0 }
 0x19d   :  { %v969_v22 = vpop.f32.mrf.mxu1  ;;  %v939_v53 = vadd.f32 %v1813_v32, %v938_v12 }
 0x19e   :  { %v970_v36 = vadd.f32 %v969_v22, %v921_v33 }
 0x1a0   :  { %1002 = vst [vmem:[%s1884_s5 + $0x28] sm:$0xff] %v970_v36 }
 0x1a4   :  { %v940_v57 = vpop.f32.mrf.mxu0 }
 0x1a5   :  { %v972_v55 = vpop.f32.mrf.mxu1  ;;  %v941_v46 = vadd.f32 %v1813_v32, %v940_v57 }
 0x1a6   :  { %v973_v56 = vadd.f32 %v972_v55, %v924_v52 }
 0x1a8   :  { %1003 = vst [vmem:[%s1884_s5 + $0x30] sm:$0xff] %v973_v56 }
 0x1ac   :  { %v943_v16 = vpop.f32.mrf.mxu0 }
 0x1ad   :  { %v974_v61 = vpop.f32.mrf.mxu1  ;;  %v944_v18 = vadd.f32 %v1813_v32, %v943_v16 }
 0x1ae   :  { %v975_v42 = vadd.f32 %v974_v61, %v926_v58 }
 0x1b0   :  { %1004 = vst [vmem:[%s1884_s5 + $0x38] sm:$0xff] %v975_v42 }
 0x1b4   :  { %v945_v25 = vpop.f32.mrf.mxu0 }
 0x1b5   :  { %v977_v1 = vpop.f32.mrf.mxu1  ;;  %v946_v13 = vadd.f32 %v1813_v32, %v945_v25 }
 0x1b6   :  { %v978_v2 = vadd.f32 %v977_v1, %v929_v63 }
 0x1b8   :  { %1005 = vst [vmem:[%s1884_s5 + $0x40] sm:$0xff] %v978_v2 }
 0x1bd   :  { %v979_v44 = vpop.f32.mrf.mxu1 }
 0x1be   :  { %v980_v7 = vadd.f32 %v979_v44, %v931_v4 }
 0x1c0   :  { %1006 = vst [vmem:[%s1884_s5 + $0x48] sm:$0xff] %v980_v7 }
 0x1c5   :  { %v982_v62 = vpop.f32.mrf.mxu1 }
 0x1c6   :  { %v983_v9 = vadd.f32 %v982_v62, %v934_v60 }
 0x1c8   :  { %1007 = vst [vmem:[%s1884_s5 + $0x50] sm:$0xff] %v983_v9 }
 0x1cd   :  { %v984_v54 = vpop.f32.mrf.mxu1 }
 0x1ce   :  { %v985_v6 = vadd.f32 %v984_v54, %v936_v14 }
 0x1d0   :  { %1008 = vst [vmem:[%s1884_s5 + $0x58] sm:$0xff] %v985_v6 }
 0x1d5   :  { %v987_v17 = vpop.f32.mrf.mxu1 }
 0x1d6   :  { %v988_v20 = vadd.f32 %v987_v17, %v939_v53 }
 0x1d8   :  { %1009 = vst [vmem:[%s1884_s5 + $0x60] sm:$0xff] %v988_v20 }
 0x1dd   :  { %v989_v23 = vpop.f32.mrf.mxu1 }
 0x1de   :  { %v990_v59 = vadd.f32 %v989_v23, %v941_v46 }
 0x1e0   :  { %1010 = vst [vmem:[%s1884_s5 + $0x68] sm:$0xff] %v990_v59 }
 0x1e5   :  { %v992_v24 = vpop.f32.mrf.mxu1 }
 0x1e6   :  { %v993_v48 = vadd.f32 %v992_v24, %v944_v18 }
 0x1e8   :  { %1011 = vst [vmem:[%s1884_s5 + $0x70] sm:$0xff] %v993_v48 }
 0x1ed   :  { %v994_v26 = vpop.f32.mrf.mxu1 }
 0x1ee   :  { %v995_v29 = vadd.f32 %v994_v26, %v946_v13 }
 0x1f0   :  { %1012 = vst [vmem:[%s1884_s5 + $0x78] sm:$0xff] %v995_v29 }

// kernel: forward.2
= control target key start
LH: loop header
LB: loop body
LE: loop exit
PB: predicated region body
PF: predicated region fallthrough
CT: control target
= control target key end

     0   :  { %10 = vsyncpa [#allocation4], 0  ;;  %s2972_s0 = inlined_call_operand.hbm [shape: f32[256,1024], index: 0, kind: input, shape index: {}]   ;;  %s2973_s1 = inlined_call_operand.vmem [shape: bf16[1024,128], index: 1, kind: input, shape index: {}]   ;;  %s2974_s2 = inlined_call_operand.vmem [shape: f32[256,1], index: 2, kind: input, shape index: {}]   ;;  %s2975_s3 = inlined_call_operand.vmem [shape: bf16[128,128], index: 3, kind: input, shape index: {}]   ;;  %s2976_s4 = inlined_call_operand.vmem [shape: f32[1,128], index: 4, kind: input, shape index: {}]   ;;  %s2977_s5 = inlined_call_operand.vmem [shape: bf16[256,256], index: 5, kind: output, shape index: {}]  }
   0x1   :  { %12 = vsyncpa [#allocation4 + $0x1], 0  ;;  %s2370_s18 = smov 0   ;;  %s2372_s19 = smov 0  }
   0x2   :  { %s2374_s20 = smov 0   ;;  %s2376_s21 = smov 0  }
   0x3   :  { %s2378_s22 = smov 0   ;;  %s2380_s23 = smov 0  }
   0x4 LB: > { %s1947_s24 = sadd.s32 4294967295, %s2333_s23   ;;  %s27_s25 = sadd.s32 1, %s2329_s22  ;;  %s2333_s23 = sphi %s2380_s23, %s18_s23   ;;  %s2329_s22 = sphi %s2378_s22, %s2984_s22   ;;  %s2325_s21 = sphi %s2376_s21, %s2983_s21   ;;  %s2321_s20 = sphi %s2374_s20, %s2982_s20   ;;  %s2317_s19 = sphi %s2372_s19, %s2981_s19   ;;  %s2313_s18 = sphi %s2370_s18, %s2980_s18  }
   0x5   : > { %p28_p0 = scmp.ge.s32.totalorder %s27_s25, 2  ;;  %s39_s26 = sadd.s32 1, %s2321_s20 }
   0x6   : > { %p46_p1 = scmp.ne.s32.totalorder %s2321_s20, %s2317_s19  ;;  %p47_p2 = scmp.eq.s32.totalorder %s2333_s23, 0 }
   0x7   : > { %s2986_s25 = smov (%p28_p0, %s27_s25), 0  ;;  %p52_p4 = scmp.ne.s32.totalorder %s2317_s19, %s2313_s18 }
   0x8   : > { %p2406_p3 = por %p47_p2, %p46_p1  ;;  %s35_s28 = ssub.s32 %s2329_s22, %s2986_s25 }
   0x9   : > { %p53_p5 = scmp.eq.s32.totalorder %s1947_s24, 0  ;;  %p37_p6 = scmp.eq.s32.totalorder %s35_s28, 0 }
   0xa   : > { %p2195_p8 = scmp.lt.s32.totalorder %s2333_s23, 2  ;;  %s211_s6 = sand.u32 1, %s2321_s20  }
   0xb   : > { %p2413_p7 = por %p53_p5, %p52_p4  ;;  %s2124_s7 = sshll.u32 %s2329_s22, 5 }
   0xc   : > { %s2419_s30 = scalar_select %p37_p6, %s2321_s20, %s39_s26  }
   0xd   : > { %s1951_s8 = sshll.u32 %s211_s6, 10  ;;  %s223_s11 = scalar_lea.hbm %s2972_s0, %s2124_s7 }
   0xe   : > { %s224_s12 = sshll.u32 %s223_s11, 4  ;;  %s215_s13 = scalar_lea.vmem [#allocation3], %s1951_s8  ;;  %s225_s12 = int_to_ptr.hbm [resolvable:$true] %s224_s12 }
   0xf   : > { %s226_s14 = sshll.u32 %s215_s13, 4  ;;  %p2192_p9 = pnand %p2195_p8, %p2406_p3  ;;  %s227_s14 = int_to_ptr.vmem [resolvable:$true] %s226_s14 }
  0x10   : > { %p1954_p10 = scmp.ge.s32.totalorder %s2333_s23, 1  ;;  %s212_s15 = scalar_lea.sflag [#allocation4], %s211_s6 }
  0x11   : > { %s2335_s16 = smov 1024   ;;  %s2336_s17 = smov 512  }
  0x12   : > { %s2337_s18 = smov 32   ;;  %p243_p11 = scmp.lt.s32.totalorder %s2333_s23, 3 }
  0x13   : > { %2194 = dma.hbm_to_vmem [thread:$0]  (!%p2192_p9), %s225_s12, 16384, %s227_s14, %s212_s15, %s2335_s16, %s2336_s17, %s2337_s18  }
  0x14   : > { %p244_p12 = pnand %p1954_p10, %p243_p11 }
  0x15   : > { %s249_s24 = sand.u32 (!%p244_p12), 1, %s2317_s19  }
  0x16   : > { %247 = sbr.rel (%p244_p12) target bundleno = 832 (0x340), region = 40  ;;  %s1955_s26 = sshll.u32 (!%p244_p12), %s249_s24, 10 }
  0x17   : > { %s250_s28 = scalar_lea.sflag (!%p244_p12), [#allocation4], %s249_s24  ;;  %s2431_s7 = scalar_lea.vmem (!%p244_p12), [#allocation3], %s1955_s26 }
  0x1b   : > { %2308 = dma.done.wait (%p2413_p7), %s250_s28, 16384  }
  0x1c   : > { %2310 = vsyncadd (%p2413_p7), %s250_s28, 4294950912  ;;  %s1956_s27 = sshll.u32 %s2325_s21, 6  ;;  %p1958_p0 = scmp.ne.s32.totalorder %s2325_s21, 0 }
  0x1d   : > { %p295_p13 = scmp.lt.s32.totalorder %s1956_s27, 127 }
  0x1e   : > { %316 = sbr.rel (%p1958_p0) target bundleno = 68 (0x44), region = 48 }
  0x1f   : > { %s2988_s27 = smov (!%p295_p13, %s1956_s27), 127 }
  0x20   : > { %s1957_s6 = sshll.u32 %s2988_s27, 2 }
  0x21   : > { %s2441_s10 = scalar_lea.vmem %s2973_s1, %s1957_s6 }
  0x23   : > { %v2338_v0 = vmov 0.0  }
  0x24   : > { %317 = vst [vmem:[#allocation2 + $0xb0] sm:$0xff] %v2338_v0 }
  0x25   : > { %318 = vst [vmem:[#allocation2] sm:$0xff] %v2338_v0 }
  0x26   : > { %319 = vst [vmem:[#allocation2 + $0xd8] sm:$0xff] %v2338_v0 }
  0x27   : > { %320 = vst [vmem:[#allocation2 + $0x18] sm:$0xff] %v2338_v0 }
  0x28   : > { %321 = vst [vmem:[#allocation2 + $0x50] sm:$0xff] %v2338_v0 }
  0x29   : > { %322 = vst [vmem:[#allocation2 + $0x68] sm:$0xff] %v2338_v0 }
  0x2a   : > { %323 = vst [vmem:[#allocation2 + $0x30] sm:$0xff] %v2338_v0 }
  0x2b   : > { %324 = vst [vmem:[#allocation2 + $0x48] sm:$0xff] %v2338_v0 }
  0x2c   : > { %325 = vst [vmem:[#allocation2 + $0x80] sm:$0xff] %v2338_v0 }
  0x2d   : > { %326 = vst [vmem:[#allocation2 + $0x88] sm:$0xff] %v2338_v0 }
  0x2e   : > { %327 = vst [vmem:[#allocation2 + $0xe8] sm:$0xff] %v2338_v0 }
  0x2f   : > { %328 = vst [vmem:[#allocation2 + $0xb8] sm:$0xff] %v2338_v0 }
  0x30   : > { %329 = vst [vmem:[#allocation2 + $0x60] sm:$0xff] %v2338_v0 }
  0x31   : > { %330 = vst [vmem:[#allocation2 + $0xf0] sm:$0xff] %v2338_v0 }
  0x32   : > { %331 = vst [vmem:[#allocation2 + $0x8] sm:$0xff] %v2338_v0 }
  0x33   : > { %332 = vst [vmem:[#allocation2 + $0x78] sm:$0xff] %v2338_v0 }
  0x34   : > { %333 = vst [vmem:[#allocation2 + $0x38] sm:$0xff] %v2338_v0 }
  0x35   : > { %334 = vst [vmem:[#allocation2 + $0x58] sm:$0xff] %v2338_v0 }
  0x36   : > { %335 = vst [vmem:[#allocation2 + $0x40] sm:$0xff] %v2338_v0 }
  0x37   : > { %336 = vst [vmem:[#allocation2 + $0xc8] sm:$0xff] %v2338_v0 }
  0x38   : > { %337 = vst [vmem:[#allocation2 + $0xe0] sm:$0xff] %v2338_v0 }
  0x39   : > { %338 = vst [vmem:[#allocation2 + $0x90] sm:$0xff] %v2338_v0 }
  0x3a   : > { %339 = vst [vmem:[#allocation2 + $0x70] sm:$0xff] %v2338_v0 }
  0x3b   : > { %340 = vst [vmem:[#allocation2 + $0xc0] sm:$0xff] %v2338_v0 }
  0x3c   : > { %341 = vst [vmem:[#allocation2 + $0xa8] sm:$0xff] %v2338_v0 }
  0x3d   : > { %342 = vst [vmem:[#allocation2 + $0xd0] sm:$0xff] %v2338_v0 }
  0x3e   : > { %343 = vst [vmem:[#allocation2 + $0x10] sm:$0xff] %v2338_v0 }
  0x3f   : > { %344 = vst [vmem:[#allocation2 + $0x28] sm:$0xff] %v2338_v0 }
  0x40   : > { %345 = vst [vmem:[#allocation2 + $0xa0] sm:$0xff] %v2338_v0 }
  0x41   : > { %346 = vst [vmem:[#allocation2 + $0xf8] sm:$0xff] %v2338_v0 }
  0x42   : > { %347 = vst [vmem:[#allocation2 + $0x20] sm:$0xff] %v2338_v0 }
  0x43   : > { %348 = vst [vmem:[#allocation2 + $0x98] sm:$0xff] %v2338_v0 }
  0x44 PF: > { %v2132_v1 = vld [vmem:[%s2441_s10 + $0x38] sm:$0xff]  ;;  %v2131_v5 = vld [vmem:[%s2441_s10 + $0x30] sm:$0xff]  ;;  %v2130_v9 = vld [vmem:[%s2441_s10 + $0x28] sm:$0xff]  ;;  %p2087_p1 = scmp.ne.s32.totalorder %s2325_s21, 1 }
  0x45   : > { %v2140_v2 = vld [vmem:[%s2441_s10 + $0x78] sm:$0xff]  ;;  %829 = vmatpush.bf16.msra.mxu0 %v2132_v1  ;;  %v2139_v6 = vld [vmem:[%s2441_s10 + $0x70] sm:$0xff]  ;;  %v2138_v10 = vld [vmem:[%s2441_s10 + $0x68] sm:$0xff] }
  0x46   : > { %v2148_v3 = vld [vmem:[%s2441_s10 + $0xb8] sm:$0xff]  ;;  %918 = vmatpush.bf16.msra.mxu1 %v2140_v2  ;;  %v2147_v7 = vld [vmem:[%s2441_s10 + $0xb0] sm:$0xff]  ;;  %v2146_v11 = vld [vmem:[%s2441_s10 + $0xa8] sm:$0xff] }
  0x47   : > { %v2156_v4 = vld [vmem:[%s2441_s10 + $0xf8] sm:$0xff]  ;;  %1007 = vmatpush.bf16.msra.mxu2 %v2148_v3  ;;  %v2155_v8 = vld [vmem:[%s2441_s10 + $0xf0] sm:$0xff]  ;;  %v2154_v12 = vld [vmem:[%s2441_s10 + $0xe8] sm:$0xff] }
  0x48   : > { %1096 = vmatpush.bf16.msra.mxu3 %v2156_v4  ;;  %v2129_v13 = vld [vmem:[%s2441_s10 + $0x20] sm:$0xff]  ;;  %v2128_v17 = vld [vmem:[%s2441_s10 + $0x18] sm:$0xff]  ;;  %v2127_v21 = vld [vmem:[%s2441_s10 + $0x10] sm:$0xff] }
  0x49   : > { %830 = vmatpush.bf16.msra.mxu0 %v2131_v5  ;;  %v2137_v14 = vld [vmem:[%s2441_s10 + $0x60] sm:$0xff]  ;;  %v2136_v18 = vld [vmem:[%s2441_s10 + $0x58] sm:$0xff]  ;;  %v2135_v22 = vld [vmem:[%s2441_s10 + $0x50] sm:$0xff] }
  0x4a   : > { %919 = vmatpush.bf16.msra.mxu1 %v2139_v6  ;;  %v2145_v15 = vld [vmem:[%s2441_s10 + $0xa0] sm:$0xff]  ;;  %v2144_v19 = vld [vmem:[%s2441_s10 + $0x98] sm:$0xff]  ;;  %v2143_v23 = vld [vmem:[%s2441_s10 + $0x90] sm:$0xff] }
  0x4b   : > { %1008 = vmatpush.bf16.msra.mxu2 %v2147_v7  ;;  %v2153_v16 = vld [vmem:[%s2441_s10 + $0xe0] sm:$0xff]  ;;  %v2152_v20 = vld [vmem:[%s2441_s10 + $0xd8] sm:$0xff]  ;;  %v2151_v24 = vld [vmem:[%s2441_s10 + $0xd0] sm:$0xff] }
  0x4c   : > { %1097 = vmatpush.bf16.msra.mxu3 %v2155_v8  ;;  %v2126_v25 = vld [vmem:[%s2441_s10 + $0x8] sm:$0xff]  ;;  %v2125_v29 = vld [vmem:[%s2441_s10] sm:$0xff]  ;;  %v351_v37 = vld [vmem:[%s2431_s7 + $0x10] sm:$0xff] }
  0x4d   : > { %831 = vmatpush.bf16.msra.mxu0 %v2130_v9  ;;  %v2134_v26 = vld [vmem:[%s2441_s10 + $0x48] sm:$0xff]  ;;  %v2133_v30 = vld [vmem:[%s2441_s10 + $0x40] sm:$0xff]  ;;  %v355_v38 = vld [vmem:[%s2431_s7 + $0x30] sm:$0xff] }
  0x4e   : > { %920 = vmatpush.bf16.msra.mxu1 %v2138_v10  ;;  %v2142_v27 = vld [vmem:[%s2441_s10 + $0x88] sm:$0xff]  ;;  %v2141_v31 = vld [vmem:[%s2441_s10 + $0x80] sm:$0xff]  ;;  %v352_v39 = vld [vmem:[%s2431_s7 + $0x18] sm:$0xff]  ;;  %v479_v43 = vpack.c.bf16 %v355_v38, %v351_v37 }
  0x4f   : > { %1009 = vmatpush.bf16.msra.mxu2 %v2146_v11  ;;  %v2150_v28 = vld [vmem:[%s2441_s10 + $0xc8] sm:$0xff]  ;;  %v2149_v32 = vld [vmem:[%s2441_s10 + $0xc0] sm:$0xff]  ;;  %v356_v40 = vld [vmem:[%s2431_s7 + $0x38] sm:$0xff] }
  0x50   : > { %1098 = vmatpush.bf16.msra.mxu3 %v2154_v12  ;;  %v349_v33 = vld [vmem:[%s2431_s7] sm:$0xff]  ;;  %v350_v35 = vld [vmem:[%s2431_s7 + $0x8] sm:$0xff]  ;;  %v480_v44 = vpack.c.bf16 %v356_v40, %v352_v39  ;;  %v359_v49 = vld [vmem:[%s2431_s7 + $0x50] sm:$0xff] }
  0x51   : > { %832 = vmatpush.bf16.msra.mxu0 %v2129_v13  ;;  %v353_v34 = vld [vmem:[%s2431_s7 + $0x20] sm:$0xff]  ;;  %v354_v36 = vld [vmem:[%s2431_s7 + $0x28] sm:$0xff]  ;;  %v363_v50 = vld [vmem:[%s2431_s7 + $0x70] sm:$0xff] }
  0x52   : > { %921 = vmatpush.bf16.msra.mxu1 %v2137_v14  ;;  %v477_v41 = vpack.c.bf16 %v353_v34, %v349_v33  ;;  %v478_v42 = vpack.c.bf16 %v354_v36, %v350_v35  ;;  %v357_v45 = vld [vmem:[%s2431_s7 + $0x40] sm:$0xff]  ;;  %v358_v47 = vld [vmem:[%s2431_s7 + $0x48] sm:$0xff]  ;;  %v360_v51 = vld [vmem:[%s2431_s7 + $0x58] sm:$0xff]  ;;  %v483_v55 = vpack.c.bf16 %v363_v50, %v359_v49 }
  0x53   : > { %1010 = vmatpush.bf16.msra.mxu2 %v2145_v15  ;;  %v361_v46 = vld [vmem:[%s2431_s7 + $0x60] sm:$0xff]  ;;  %v362_v48 = vld [vmem:[%s2431_s7 + $0x68] sm:$0xff]  ;;  %v364_v52 = vld [vmem:[%s2431_s7 + $0x78] sm:$0xff] }
  0x54   : > { %1099 = vmatpush.bf16.msra.mxu3 %v2153_v16  ;;  %v481_v53 = vpack.c.bf16 %v361_v46, %v357_v45  ;;  %v482_v54 = vpack.c.bf16 %v362_v48, %v358_v47  ;;  %v484_v56 = vpack.c.bf16 %v364_v52, %v360_v51  ;;  %v365_v57 = vld [vmem:[%s2431_s7 + $0x80] sm:$0xff]  ;;  %v366_v59 = vld [vmem:[%s2431_s7 + $0x88] sm:$0xff]  ;;  %v367_v61 = vld [vmem:[%s2431_s7 + $0x90] sm:$0xff] }
  0x55   : > { %833 = vmatpush.bf16.msra.mxu0 %v2128_v17  ;;  %v369_v58 = vld [vmem:[%s2431_s7 + $0xa0] sm:$0xff]  ;;  %v370_v60 = vld [vmem:[%s2431_s7 + $0xa8] sm:$0xff]  ;;  %v371_v62 = vld [vmem:[%s2431_s7 + $0xb0] sm:$0xff] }
  0x56   : > { %922 = vmatpush.bf16.msra.mxu1 %v2136_v18  ;;  %v368_v63 = vld [vmem:[%s2431_s7 + $0x98] sm:$0xff]  ;;  %v485_v1 = vpack.c.bf16 %v369_v58, %v365_v57  ;;  %v486_v2 = vpack.c.bf16 %v370_v60, %v366_v59  ;;  %v487_v3 = vpack.c.bf16 %v371_v62, %v367_v61  ;;  %v373_v5 = vld [vmem:[%s2431_s7 + $0xc0] sm:$0xff]  ;;  %v374_v7 = vld [vmem:[%s2431_s7 + $0xc8] sm:$0xff] }
  0x57   : > { %1011 = vmatpush.bf16.msra.mxu2 %v2144_v19  ;;  %v372_v0 = vld [vmem:[%s2431_s7 + $0xb8] sm:$0xff]  ;;  %v377_v6 = vld [vmem:[%s2431_s7 + $0xe0] sm:$0xff]  ;;  %v378_v8 = vld [vmem:[%s2431_s7 + $0xe8] sm:$0xff] }
  0x58   : > { %1100 = vmatpush.bf16.msra.mxu3 %v2152_v20  ;;  %v488_v4 = vpack.c.bf16 %v372_v0, %v368_v63  ;;  %v375_v9 = vld [vmem:[%s2431_s7 + $0xd0] sm:$0xff]  ;;  %v376_v11 = vld [vmem:[%s2431_s7 + $0xd8] sm:$0xff]  ;;  %v489_v13 = vpack.c.bf16 %v377_v6, %v373_v5  ;;  %v490_v14 = vpack.c.bf16 %v378_v8, %v374_v7  ;;  %v381_v17 = vld [vmem:[%s2431_s7 + $0x100] sm:$0xff] }
  0x59   : > { %834 = vmatpush.bf16.msra.mxu0 %v2127_v21  ;;  %v379_v10 = vld [vmem:[%s2431_s7 + $0xf0] sm:$0xff]  ;;  %v380_v12 = vld [vmem:[%s2431_s7 + $0xf8] sm:$0xff]  ;;  %v385_v18 = vld [vmem:[%s2431_s7 + $0x120] sm:$0xff] }
  0x5a   : > { %923 = vmatpush.bf16.msra.mxu1 %v2135_v22  ;;  %v491_v15 = vpack.c.bf16 %v379_v10, %v375_v9  ;;  %v492_v16 = vpack.c.bf16 %v380_v12, %v376_v11  ;;  %v382_v19 = vld [vmem:[%s2431_s7 + $0x108] sm:$0xff]  ;;  %v383_v21 = vld [vmem:[%s2431_s7 + $0x110] sm:$0xff]  ;;  %v392_v35 = vld [vmem:[%s2431_s7 + $0x158] sm:$0xff] }
  0x5b   : > { %1012 = vmatpush.bf16.msra.mxu2 %v2143_v23  ;;  %v386_v20 = vld [vmem:[%s2431_s7 + $0x128] sm:$0xff]  ;;  %v387_v22 = vld [vmem:[%s2431_s7 + $0x130] sm:$0xff]  ;;  %v384_v23 = vld [vmem:[%s2431_s7 + $0x118] sm:$0xff] }
  0x5c   : > { %1101 = vmatpush.bf16.msra.mxu3 %v2151_v24  ;;  %v388_v24 = vld [vmem:[%s2431_s7 + $0x138] sm:$0xff]  ;;  %v391_v33 = vld [vmem:[%s2431_s7 + $0x150] sm:$0xff] }
  0x5d   : > { %835 = vmatpush.bf16.msra.mxu0 %v2126_v25  ;;  %v493_v25 = vpack.c.bf16 %v385_v18, %v381_v17  ;;  %v395_v34 = vld [vmem:[%s2431_s7 + $0x170] sm:$0xff]  ;;  %v396_v36 = vld [vmem:[%s2431_s7 + $0x178] sm:$0xff] }
  0x5e   : > { %924 = vmatpush.bf16.msra.mxu1 %v2134_v26  ;;  %v494_v26 = vpack.c.bf16 %v386_v20, %v382_v19  ;;  %v499_v39 = vpack.c.bf16 %v395_v34, %v391_v33  ;;  %v500_v40 = vpack.c.bf16 %v396_v36, %v392_v35  ;;  %v399_v45 = vld [vmem:[%s2431_s7 + $0x190] sm:$0xff]  ;;  %v400_v47 = vld [vmem:[%s2431_s7 + $0x198] sm:$0xff] }
  0x5f   : > { %1013 = vmatpush.bf16.msra.mxu2 %v2142_v27  ;;  %v495_v27 = vpack.c.bf16 %v387_v22, %v383_v21  ;;  %v403_v46 = vld [vmem:[%s2431_s7 + $0x1b0] sm:$0xff]  ;;  %v404_v48 = vld [vmem:[%s2431_s7 + $0x1b8] sm:$0xff] }
  0x60   : > { %1102 = vmatpush.bf16.msra.mxu3 %v2150_v28  ;;  %v496_v28 = vpack.c.bf16 %v388_v24, %v384_v23  ;;  %v503_v51 = vpack.c.bf16 %v403_v46, %v399_v45  ;;  %v504_v52 = vpack.c.bf16 %v404_v48, %v400_v47  ;;  %v407_v57 = vld [vmem:[%s2431_s7 + $0x1d0] sm:$0xff]  ;;  %v408_v59 = vld [vmem:[%s2431_s7 + $0x1d8] sm:$0xff]  ;;  %v421_v23 = vld [vmem:[%s2431_s7 + $0x240] sm:$0xff] }
  0x61   : > { %836 = vmatpush.bf16.msra.mxu0 %v2125_v29  ;;  %v389_v29 = vld [vmem:[%s2431_s7 + $0x140] sm:$0xff]  ;;  %v411_v58 = vld [vmem:[%s2431_s7 + $0x1f0] sm:$0xff]  ;;  %v412_v60 = vld [vmem:[%s2431_s7 + $0x1f8] sm:$0xff] }
  0x62   : > { %925 = vmatpush.bf16.msra.mxu1 %v2133_v30  ;;  %v393_v30 = vld [vmem:[%s2431_s7 + $0x160] sm:$0xff]  ;;  %v507_v63 = vpack.c.bf16 %v411_v58, %v407_v57  ;;  %v508_v0 = vpack.c.bf16 %v412_v60, %v408_v59  ;;  %v415_v5 = vld [vmem:[%s2431_s7 + $0x210] sm:$0xff]  ;;  %v416_v7 = vld [vmem:[%s2431_s7 + $0x218] sm:$0xff] }
  0x63   : > { %1014 = vmatpush.bf16.msra.mxu2 %v2141_v31  ;;  %v390_v31 = vld [vmem:[%s2431_s7 + $0x148] sm:$0xff]  ;;  %v497_v37 = vpack.c.bf16 %v393_v30, %v389_v29  ;;  %v419_v6 = vld [vmem:[%s2431_s7 + $0x230] sm:$0xff]  ;;  %v420_v8 = vld [vmem:[%s2431_s7 + $0x238] sm:$0xff] }
  0x64   : > { %1103 = vmatpush.bf16.msra.mxu3 %v2149_v32  ;;  %837 = vmatmul.bf16.vlgmr.msra.gmra.mxu0 %v477_v41  ;;  %v394_v32 = vld [vmem:[%s2431_s7 + $0x168] sm:$0xff]  ;;  %v397_v41 = vld [vmem:[%s2431_s7 + $0x180] sm:$0xff]  ;;  %v605_v21 = vld [vmem:[#allocation2 + $0xb0] sm:$0xff] }
  0x65   : > { %926 = vmatmul.bf16.vlgmr.msra.gmra.mxu1 %v478_v42  ;;  %v498_v38 = vpack.c.bf16 %v394_v32, %v390_v31  ;;  %v401_v42 = vld [vmem:[%s2431_s7 + $0x1a0] sm:$0xff]  ;;  %v427_v29 = vld [vmem:[%s2431_s7 + $0x270] sm:$0xff]  ;;  %v424_v30 = vld [vmem:[%s2431_s7 + $0x258] sm:$0xff] }
  0x66   : > { %1015 = vmatmul.bf16.vlgmr.msra.gmra.mxu2 %v479_v43  ;;  %v398_v43 = vld [vmem:[%s2431_s7 + $0x188] sm:$0xff]  ;;  %v501_v49 = vpack.c.bf16 %v401_v42, %v397_v41  ;;  %v425_v24 = vld [vmem:[%s2431_s7 + $0x260] sm:$0xff]  ;;  %v428_v31 = vld [vmem:[%s2431_s7 + $0x278] sm:$0xff] }
  0x67   : > { %1104 = vmatmul.bf16.vlgmr.msra.gmra.mxu3 %v480_v44  ;;  %v402_v44 = vld [vmem:[%s2431_s7 + $0x1a8] sm:$0xff]  ;;  %v513_v35 = vpack.c.bf16 %v425_v24, %v421_v23  ;;  %v516_v41 = vpack.c.bf16 %v428_v31, %v424_v30  ;;  %v606_v42 = vld [vmem:[#allocation2] sm:$0xff]  ;;  %v431_v58 = vld [vmem:[%s2431_s7 + $0x290] sm:$0xff] }
  0x68   : > { %v502_v50 = vpack.c.bf16 %v402_v44, %v398_v43  ;;  %v434_v57 = vld [vmem:[%s2431_s7 + $0x2a8] sm:$0xff]  ;;  %v435_v59 = vld [vmem:[%s2431_s7 + $0x2b0] sm:$0xff]  ;;  %v432_v60 = vld [vmem:[%s2431_s7 + $0x298] sm:$0xff] }
  0x69   : > { %v442_v23 = vld [vmem:[%s2431_s7 + $0x2e8] sm:$0xff]  ;;  %v439_v24 = vld [vmem:[%s2431_s7 + $0x2d0] sm:$0xff] }
  0x74   : > { %842 = vmatmul.bf16.gmra.mxu0 %v481_v53  ;;  %v405_v53 = vld [vmem:[%s2431_s7 + $0x1c0] sm:$0xff] }
  0x75   : > { %931 = vmatmul.bf16.gmra.mxu1 %v482_v54  ;;  %v409_v54 = vld [vmem:[%s2431_s7 + $0x1e0] sm:$0xff] }
  0x76   : > { %1020 = vmatmul.bf16.gmra.mxu2 %v483_v55  ;;  %v406_v55 = vld [vmem:[%s2431_s7 + $0x1c8] sm:$0xff]  ;;  %v505_v61 = vpack.c.bf16 %v409_v54, %v405_v53  ;;  %v429_v53 = vld [vmem:[%s2431_s7 + $0x280] sm:$0xff] }
  0x77   : > { %1109 = vmatmul.bf16.gmra.mxu3 %v484_v56  ;;  %v410_v56 = vld [vmem:[%s2431_s7 + $0x1e8] sm:$0xff]  ;;  %v433_v54 = vld [vmem:[%s2431_s7 + $0x2a0] sm:$0xff] }
  0x78   : > { %v506_v62 = vpack.c.bf16 %v410_v56, %v406_v55  ;;  %v430_v56 = vld [vmem:[%s2431_s7 + $0x288] sm:$0xff] }
  0x84   : > { %847 = vmatmul.bf16.gmra.mxu0 %v485_v1  ;;  %v413_v1 = vld [vmem:[%s2431_s7 + $0x200] sm:$0xff] }
  0x85   : > { %936 = vmatmul.bf16.gmra.mxu1 %v486_v2  ;;  %v417_v2 = vld [vmem:[%s2431_s7 + $0x220] sm:$0xff] }
  0x86   : > { %1025 = vmatmul.bf16.gmra.mxu2 %v487_v3  ;;  %v414_v3 = vld [vmem:[%s2431_s7 + $0x208] sm:$0xff]  ;;  %v509_v9 = vpack.c.bf16 %v417_v2, %v413_v1  ;;  %v517_v1 = vpack.c.bf16 %v433_v54, %v429_v53  ;;  %v518_v2 = vpack.c.bf16 %v434_v57, %v430_v56  ;;  %v447_v54 = vld [vmem:[%s2431_s7 + $0x310] sm:$0xff]  ;;  %v448_v56 = vld [vmem:[%s2431_s7 + $0x318] sm:$0xff] }
  0x87   : > { %1114 = vmatmul.bf16.gmra.mxu3 %v488_v4  ;;  %v418_v4 = vld [vmem:[%s2431_s7 + $0x228] sm:$0xff]  ;;  %v452_v57 = vld [vmem:[%s2431_s7 + $0x338] sm:$0xff] }
  0x88   : > { %v510_v10 = vpack.c.bf16 %v418_v4, %v414_v3  ;;  %v450_v53 = vld [vmem:[%s2431_s7 + $0x328] sm:$0xff] }
  0x94   : > { %852 = vmatmul.bf16.gmra.mxu0 %v489_v13  ;;  %v511_v13 = vpack.c.bf16 %v419_v6, %v415_v5  ;;  %v519_v6 = vpack.c.bf16 %v435_v59, %v431_v58 }
  0x95   : > { %941 = vmatmul.bf16.gmra.mxu1 %v490_v14  ;;  %v512_v14 = vpack.c.bf16 %v420_v8, %v416_v7  ;;  %v608_v8 = vld [vmem:[#allocation2 + $0x18] sm:$0xff] }
  0x96   : > { %1030 = vmatmul.bf16.gmra.mxu2 %v491_v15 }
  0x97   : > { %1119 = vmatmul.bf16.gmra.mxu3 %v492_v16 }
  0xa4   : > { %857 = vmatmul.bf16.gmra.mxu0 %v493_v25 }
  0xa5   : > { %946 = vmatmul.bf16.gmra.mxu1 %v494_v26  ;;  %v422_v26 = vld [vmem:[%s2431_s7 + $0x248] sm:$0xff] }
  0xa6   : > { %1035 = vmatmul.bf16.gmra.mxu2 %v495_v27  ;;  %v426_v27 = vld [vmem:[%s2431_s7 + $0x268] sm:$0xff] }
  0xa7   : > { %1124 = vmatmul.bf16.gmra.mxu3 %v496_v28  ;;  %v423_v28 = vld [vmem:[%s2431_s7 + $0x250] sm:$0xff]  ;;  %v514_v36 = vpack.c.bf16 %v426_v27, %v422_v26  ;;  %v440_v26 = vld [vmem:[%s2431_s7 + $0x2d8] sm:$0xff] }
  0xa8   : > { %v444_v27 = vld [vmem:[%s2431_s7 + $0x2f8] sm:$0xff] }
  0xb4   : > { %862 = vmatmul.bf16.gmra.mxu0 %v497_v37 }
  0xb5   : > { %951 = vmatmul.bf16.gmra.mxu1 %v498_v38 }
  0xb6   : > { %1040 = vmatmul.bf16.gmra.mxu2 %v499_v39 }
  0xb7   : > { %1129 = vmatmul.bf16.gmra.mxu3 %v500_v40  ;;  %v515_v40 = vpack.c.bf16 %v427_v29, %v423_v28 }
  0xc4   : > { %867 = vmatmul.bf16.gmra.mxu0 %v501_v49 }
  0xc5   : > { %956 = vmatmul.bf16.gmra.mxu1 %v502_v50 }
  0xc6   : > { %1045 = vmatmul.bf16.gmra.mxu2 %v503_v51  ;;  %v607_v51 = vld [vmem:[#allocation2 + $0xd8] sm:$0xff] }
  0xc7   : > { %1134 = vmatmul.bf16.gmra.mxu3 %v504_v52 }
  0xd4   : > { %872 = vmatmul.bf16.gmra.mxu0 %v505_v61  ;;  %v436_v61 = vld [vmem:[%s2431_s7 + $0x2b8] sm:$0xff] }
  0xd5   : > { %961 = vmatmul.bf16.gmra.mxu1 %v506_v62  ;;  %v520_v7 = vpack.c.bf16 %v436_v61, %v432_v60 }
  0xd6   : > { %1050 = vmatmul.bf16.gmra.mxu2 %v507_v63 }
  0xd7   : > { %1139 = vmatmul.bf16.gmra.mxu3 %v508_v0 }
  0xe1   : > { %v838_v11 = vpop.f32.mrf.mxu0 }
  0xe2   : > { %v927_v12 = vpop.f32.mrf.mxu1 }
  0xe3   : > { %v928_v15 = vadd.f32 %v927_v12, %v838_v11 }
  0xe4   : > { %877 = vmatmul.bf16.gmra.mxu0 %v509_v9 }
  0xe5   : > { %966 = vmatmul.bf16.gmra.mxu1 %v510_v10 }
  0xe6   : > { %1055 = vmatmul.bf16.gmra.mxu2 %v511_v13 }
  0xe7   : > { %1144 = vmatmul.bf16.gmra.mxu3 %v512_v14 }
  0xe9   : > { %v1016_v16 = vpop.f32.mrf.mxu2  ;;  %v840_v19 = vpop.f32.mrf.mxu0 }
  0xea   : > { %v1105_v17 = vpop.f32.mrf.mxu3  ;;  %v1017_v18 = vadd.f32 %v1016_v16, %v928_v15  ;;  %v929_v20 = vpop.f32.mrf.mxu1 }
  0xeb   : > { %v930_v32 = vadd.f32 %v929_v20, %v840_v19  ;;  %v437_v19 = vld [vmem:[%s2431_s7 + $0x2c0] sm:$0xff] }
  0xec   : > { %v1106_v22 = vadd.f32 %v1105_v17, %v1017_v18  ;;  %v609_v17 = vld [vmem:[#allocation2 + $0x50] sm:$0xff]  ;;  %v441_v20 = vld [vmem:[%s2431_s7 + $0x2e0] sm:$0xff] }
  0xed   : > { %v521_v31 = vpack.c.bf16 %v441_v20, %v437_v19  ;;  %v458_v19 = vld [vmem:[%s2431_s7 + $0x368] sm:$0xff]  ;;  %v455_v20 = vld [vmem:[%s2431_s7 + $0x350] sm:$0xff] }
  0xee   : > { %v1185_v25 = vadd.f32 %v1106_v22, %v605_v21  ;;  %v438_v22 = vld [vmem:[%s2431_s7 + $0x2c8] sm:$0xff] }
  0xf0   : > { %1217 = vst [vmem:[#allocation2 + $0xb0] sm:$0xff] %v1185_v25  ;;  %v443_v25 = vld [vmem:[%s2431_s7 + $0x2f0] sm:$0xff] }
  0xf1   : > { %v1018_v33 = vpop.f32.mrf.mxu2  ;;  %v843_v38 = vpop.f32.mrf.mxu0 }
  0xf2   : > { %v1107_v34 = vpop.f32.mrf.mxu3  ;;  %v1019_v37 = vadd.f32 %v1018_v33, %v930_v32  ;;  %v932_v39 = vpop.f32.mrf.mxu1  ;;  %v522_v32 = vpack.c.bf16 %v442_v23, %v438_v22  ;;  %v456_v22 = vld [vmem:[%s2431_s7 + $0x358] sm:$0xff] }
  0xf3   : > { %v933_v45 = vadd.f32 %v932_v39, %v843_v38  ;;  %v610_v38 = vld [vmem:[#allocation2 + $0x68] sm:$0xff]  ;;  %v460_v23 = vld [vmem:[%s2431_s7 + $0x378] sm:$0xff] }
  0xf4   : > { %v1108_v43 = vadd.f32 %v1107_v34, %v1019_v37  ;;  %882 = vmatmul.bf16.gmra.mxu0 %v513_v35  ;;  %v524_v37 = vpack.c.bf16 %v444_v27, %v440_v26 }
  0xf5   : > { %971 = vmatmul.bf16.gmra.mxu1 %v514_v36  ;;  %v523_v36 = vpack.c.bf16 %v443_v25, %v439_v24 }
  0xf6   : > { %v1186_v44 = vadd.f32 %v1108_v43, %v606_v42  ;;  %1060 = vmatmul.bf16.gmra.mxu2 %v515_v40 }
  0xf7   : > { %1149 = vmatmul.bf16.gmra.mxu3 %v516_v41 }
  0xf8   : > { %1218 = vst [vmem:[#allocation2] sm:$0xff] %v1186_v44 }
  0xf9   : > { %v1021_v46 = vpop.f32.mrf.mxu2  ;;  %v845_v49 = vpop.f32.mrf.mxu0 }
  0xfa   : > { %v1110_v47 = vpop.f32.mrf.mxu3  ;;  %v1022_v48 = vadd.f32 %v1021_v46, %v933_v45  ;;  %v934_v50 = vpop.f32.mrf.mxu1 }
  0xfb   : > { %v935_v62 = vadd.f32 %v934_v50, %v845_v49  ;;  %v445_v49 = vld [vmem:[%s2431_s7 + $0x300] sm:$0xff] }
  0xfc   : > { %v1111_v52 = vadd.f32 %v1110_v47, %v1022_v48  ;;  %v611_v47 = vld [vmem:[#allocation2 + $0x30] sm:$0xff]  ;;  %v449_v50 = vld [vmem:[%s2431_s7 + $0x320] sm:$0xff] }
  0xfd   : > { %v525_v61 = vpack.c.bf16 %v449_v50, %v445_v49  ;;  %v466_v49 = vld [vmem:[%s2431_s7 + $0x3a8] sm:$0xff]  ;;  %v463_v50 = vld [vmem:[%s2431_s7 + $0x390] sm:$0xff] }
  0xfe   : > { %v1187_v55 = vadd.f32 %v1111_v52, %v607_v51  ;;  %v446_v52 = vld [vmem:[%s2431_s7 + $0x308] sm:$0xff] }
 0x100   : > { %1219 = vst [vmem:[#allocation2 + $0xd8] sm:$0xff] %v1187_v55  ;;  %v451_v55 = vld [vmem:[%s2431_s7 + $0x330] sm:$0xff] }
 0x101   : > { %v1023_v63 = vpop.f32.mrf.mxu2  ;;  %v848_v4 = vpop.f32.mrf.mxu0 }
 0x102   : > { %v1112_v0 = vpop.f32.mrf.mxu3  ;;  %v1024_v3 = vadd.f32 %v1023_v63, %v935_v62  ;;  %v937_v5 = vpop.f32.mrf.mxu1  ;;  %v526_v62 = vpack.c.bf16 %v450_v53, %v446_v52  ;;  %v464_v52 = vld [vmem:[%s2431_s7 + $0x398] sm:$0xff] }
 0x103   : > { %v938_v11 = vadd.f32 %v937_v5, %v848_v4  ;;  %v612_v4 = vld [vmem:[#allocation2 + $0x48] sm:$0xff]  ;;  %v468_v53 = vld [vmem:[%s2431_s7 + $0x3b8] sm:$0xff] }
 0x104   : > { %v1113_v9 = vadd.f32 %v1112_v0, %v1024_v3  ;;  %887 = vmatmul.bf16.gmra.mxu0 %v517_v1  ;;  %v528_v3 = vpack.c.bf16 %v452_v57, %v448_v56 }
 0x105   : > { %976 = vmatmul.bf16.gmra.mxu1 %v518_v2  ;;  %v527_v2 = vpack.c.bf16 %v451_v55, %v447_v54 }
 0x106   : > { %v1188_v10 = vadd.f32 %v1113_v9, %v608_v8  ;;  %1065 = vmatmul.bf16.gmra.mxu2 %v519_v6 }
 0x107   : > { %1154 = vmatmul.bf16.gmra.mxu3 %v520_v7 }
 0x108   : > { %1220 = vst [vmem:[#allocation2 + $0x18] sm:$0xff] %v1188_v10 }
 0x109   : > { %v1026_v12 = vpop.f32.mrf.mxu2  ;;  %v850_v15 = vpop.f32.mrf.mxu0 }
 0x10a   : > { %v1115_v13 = vpop.f32.mrf.mxu3  ;;  %v1027_v14 = vadd.f32 %v1026_v12, %v938_v11  ;;  %v939_v16 = vpop.f32.mrf.mxu1 }
 0x10b   : > { %v940_v28 = vadd.f32 %v939_v16, %v850_v15  ;;  %v453_v15 = vld [vmem:[%s2431_s7 + $0x340] sm:$0xff] }
 0x10c   : > { %v1116_v18 = vadd.f32 %v1115_v13, %v1027_v14  ;;  %v613_v13 = vld [vmem:[#allocation2 + $0x80] sm:$0xff] }
 0x10d   : > { %v457_v16 = vld [vmem:[%s2431_s7 + $0x360] sm:$0xff] }
 0x10e   : > { %v1189_v21 = vadd.f32 %v1116_v18, %v609_v17  ;;  %v454_v18 = vld [vmem:[%s2431_s7 + $0x348] sm:$0xff]  ;;  %v529_v27 = vpack.c.bf16 %v457_v16, %v453_v15  ;;  %v471_v16 = vld [vmem:[%s2431_s7 + $0x3d0] sm:$0xff] }
 0x10f   : > { %v474_v15 = vld [vmem:[%s2431_s7 + $0x3e8] sm:$0xff] }
 0x110   : > { %1221 = vst [vmem:[#allocation2 + $0x50] sm:$0xff] %v1189_v21  ;;  %v459_v21 = vld [vmem:[%s2431_s7 + $0x370] sm:$0xff] }
 0x111   : > { %v1028_v29 = vpop.f32.mrf.mxu2  ;;  %v853_v34 = vpop.f32.mrf.mxu0 }
 0x112   : > { %v1117_v30 = vpop.f32.mrf.mxu3  ;;  %v1029_v33 = vadd.f32 %v1028_v29, %v940_v28  ;;  %v942_v35 = vpop.f32.mrf.mxu1  ;;  %v530_v28 = vpack.c.bf16 %v458_v19, %v454_v18  ;;  %v472_v18 = vld [vmem:[%s2431_s7 + $0x3d8] sm:$0xff] }
 0x113   : > { %v943_v41 = vadd.f32 %v942_v35, %v853_v34  ;;  %v614_v34 = vld [vmem:[#allocation2 + $0x88] sm:$0xff]  ;;  %v476_v19 = vld [vmem:[%s2431_s7 + $0x3f8] sm:$0xff] }
 0x114   : > { %v1118_v39 = vadd.f32 %v1117_v30, %v1029_v33  ;;  %892 = vmatmul.bf16.gmra.mxu0 %v521_v31  ;;  %v532_v33 = vpack.c.bf16 %v460_v23, %v456_v22 }
 0x115   : > { %981 = vmatmul.bf16.gmra.mxu1 %v522_v32  ;;  %v531_v32 = vpack.c.bf16 %v459_v21, %v455_v20 }
 0x116   : > { %v1190_v40 = vadd.f32 %v1118_v39, %v610_v38  ;;  %1070 = vmatmul.bf16.gmra.mxu2 %v523_v36 }
 0x117   : > { %1159 = vmatmul.bf16.gmra.mxu3 %v524_v37 }
 0x118   : > { %1222 = vst [vmem:[#allocation2 + $0x68] sm:$0xff] %v1190_v40 }
 0x119   : > { %v1031_v42 = vpop.f32.mrf.mxu2  ;;  %v855_v45 = vpop.f32.mrf.mxu0 }
 0x11a   : > { %v1120_v43 = vpop.f32.mrf.mxu3  ;;  %v1032_v44 = vadd.f32 %v1031_v42, %v943_v41  ;;  %v944_v46 = vpop.f32.mrf.mxu1 }
 0x11b   : > { %v945_v58 = vadd.f32 %v944_v46, %v855_v45  ;;  %v461_v45 = vld [vmem:[%s2431_s7 + $0x380] sm:$0xff] }
 0x11c   : > { %v1121_v48 = vadd.f32 %v1120_v43, %v1032_v44  ;;  %v615_v43 = vld [vmem:[#allocation2 + $0xe8] sm:$0xff]  ;;  %v465_v46 = vld [vmem:[%s2431_s7 + $0x3a0] sm:$0xff] }
 0x11d   : > { %v533_v57 = vpack.c.bf16 %v465_v46, %v461_v45 }
 0x11e   : > { %v1191_v51 = vadd.f32 %v1121_v48, %v611_v47  ;;  %v462_v48 = vld [vmem:[%s2431_s7 + $0x388] sm:$0xff] }
 0x120   : > { %1223 = vst [vmem:[#allocation2 + $0x30] sm:$0xff] %v1191_v51  ;;  %v467_v51 = vld [vmem:[%s2431_s7 + $0x3b0] sm:$0xff] }
 0x121   : > { %v1033_v59 = vpop.f32.mrf.mxu2  ;;  %v858_v0 = vpop.f32.mrf.mxu0 }
 0x122   : > { %v1122_v60 = vpop.f32.mrf.mxu3  ;;  %v1034_v63 = vadd.f32 %v1033_v59, %v945_v58  ;;  %v947_v1 = vpop.f32.mrf.mxu1  ;;  %v534_v58 = vpack.c.bf16 %v466_v49, %v462_v48  ;;  %v620_v48 = vld [vmem:[#allocation2 + $0x78] sm:$0xff] }
 0x123   : > { %v948_v7 = vadd.f32 %v947_v1, %v858_v0  ;;  %v616_v0 = vld [vmem:[#allocation2 + $0xb8] sm:$0xff] }
 0x124   : > { %v1123_v5 = vadd.f32 %v1122_v60, %v1034_v63  ;;  %897 = vmatmul.bf16.gmra.mxu0 %v525_v61  ;;  %v536_v63 = vpack.c.bf16 %v468_v53, %v464_v52 }
 0x125   : > { %986 = vmatmul.bf16.gmra.mxu1 %v526_v62  ;;  %v535_v62 = vpack.c.bf16 %v467_v51, %v463_v50 }
 0x126   : > { %v1192_v6 = vadd.f32 %v1123_v5, %v612_v4  ;;  %1075 = vmatmul.bf16.gmra.mxu2 %v527_v2 }
 0x127   : > { %1164 = vmatmul.bf16.gmra.mxu3 %v528_v3 }
 0x128   : > { %1224 = vst [vmem:[#allocation2 + $0x48] sm:$0xff] %v1192_v6 }
 0x129   : > { %v1036_v8 = vpop.f32.mrf.mxu2  ;;  %v860_v11 = vpop.f32.mrf.mxu0 }
 0x12a   : > { %v1125_v9 = vpop.f32.mrf.mxu3  ;;  %v1037_v10 = vadd.f32 %v1036_v8, %v948_v7  ;;  %v949_v12 = vpop.f32.mrf.mxu1 }
 0x12b   : > { %v950_v24 = vadd.f32 %v949_v12, %v860_v11  ;;  %v469_v11 = vld [vmem:[%s2431_s7 + $0x3c0] sm:$0xff] }
 0x12c   : > { %v1126_v14 = vadd.f32 %v1125_v9, %v1037_v10  ;;  %v617_v9 = vld [vmem:[#allocation2 + $0x60] sm:$0xff] }
 0x12d   : > { %v473_v12 = vld [vmem:[%s2431_s7 + $0x3e0] sm:$0xff] }
 0x12e   : > { %v1193_v17 = vadd.f32 %v1126_v14, %v613_v13  ;;  %v470_v14 = vld [vmem:[%s2431_s7 + $0x3c8] sm:$0xff]  ;;  %v537_v23 = vpack.c.bf16 %v473_v12, %v469_v11  ;;  %v623_v11 = vld [vmem:[#allocation2 + $0x40] sm:$0xff] }
 0x130   : > { %1225 = vst [vmem:[#allocation2 + $0x80] sm:$0xff] %v1193_v17  ;;  %v475_v17 = vld [vmem:[%s2431_s7 + $0x3f0] sm:$0xff] }
 0x131   : > { %v1038_v25 = vpop.f32.mrf.mxu2  ;;  %v863_v30 = vpop.f32.mrf.mxu0 }
 0x132   : > { %v1127_v26 = vpop.f32.mrf.mxu3  ;;  %v1039_v29 = vadd.f32 %v1038_v25, %v950_v24  ;;  %v952_v31 = vpop.f32.mrf.mxu1  ;;  %v538_v24 = vpack.c.bf16 %v474_v15, %v470_v14 }
 0x133   : > { %v953_v37 = vadd.f32 %v952_v31, %v863_v30  ;;  %v618_v30 = vld [vmem:[#allocation2 + $0xf0] sm:$0xff] }
 0x134   : > { %v1128_v35 = vadd.f32 %v1127_v26, %v1039_v29  ;;  %902 = vmatmul.bf16.gmra.mxu0 %v529_v27  ;;  %v540_v29 = vpack.c.bf16 %v476_v19, %v472_v18 }
 0x135   : > { %991 = vmatmul.bf16.gmra.mxu1 %v530_v28  ;;  %v539_v28 = vpack.c.bf16 %v475_v17, %v471_v16 }
 0x136   : > { %v1194_v36 = vadd.f32 %v1128_v35, %v614_v34  ;;  %1080 = vmatmul.bf16.gmra.mxu2 %v531_v32 }
 0x137   : > { %1169 = vmatmul.bf16.gmra.mxu3 %v532_v33 }
 0x138   : > { %1226 = vst [vmem:[#allocation2 + $0x88] sm:$0xff] %v1194_v36 }
 0x139   : > { %v1041_v38 = vpop.f32.mrf.mxu2  ;;  %v865_v41 = vpop.f32.mrf.mxu0 }
 0x13a   : > { %v1130_v39 = vpop.f32.mrf.mxu3  ;;  %v1042_v40 = vadd.f32 %v1041_v38, %v953_v37  ;;  %v954_v42 = vpop.f32.mrf.mxu1 }
 0x13b   : > { %v955_v54 = vadd.f32 %v954_v42, %v865_v41 }
 0x13c   : > { %v1131_v44 = vadd.f32 %v1130_v39, %v1042_v40  ;;  %v619_v39 = vld [vmem:[#allocation2 + $0x8] sm:$0xff] }
 0x13e   : > { %v1195_v47 = vadd.f32 %v1131_v44, %v615_v43 }
 0x140   : > { %1227 = vst [vmem:[#allocation2 + $0xe8] sm:$0xff] %v1195_v47 }
 0x141   : > { %v1043_v55 = vpop.f32.mrf.mxu2  ;;  %v868_v60 = vpop.f32.mrf.mxu0 }
 0x142   : > { %v1132_v56 = vpop.f32.mrf.mxu3  ;;  %v1044_v59 = vadd.f32 %v1043_v55, %v955_v54  ;;  %v957_v61 = vpop.f32.mrf.mxu1 }
 0x143   : > { %v958_v3 = vadd.f32 %v957_v61, %v868_v60 }
 0x144   : > { %v1133_v1 = vadd.f32 %v1132_v56, %v1044_v59  ;;  %907 = vmatmul.bf16.gmra.mxu0 %v533_v57  ;;  %v621_v57 = vld [vmem:[#allocation2 + $0x38] sm:$0xff] }
 0x145   : > { %996 = vmatmul.bf16.gmra.mxu1 %v534_v58 }
 0x146   : > { %v1196_v2 = vadd.f32 %v1133_v1, %v616_v0  ;;  %1085 = vmatmul.bf16.gmra.mxu2 %v535_v62 }
 0x147   : > { %1174 = vmatmul.bf16.gmra.mxu3 %v536_v63 }
 0x148   : > { %1228 = vst [vmem:[#allocation2 + $0xb8] sm:$0xff] %v1196_v2  ;;  %v622_v2 = vld [vmem:[#allocation2 + $0x58] sm:$0xff] }
 0x149   : > { %v1046_v4 = vpop.f32.mrf.mxu2  ;;  %v870_v7 = vpop.f32.mrf.mxu0 }
 0x14a   : > { %v1135_v5 = vpop.f32.mrf.mxu3  ;;  %v1047_v6 = vadd.f32 %v1046_v4, %v958_v3  ;;  %v959_v8 = vpop.f32.mrf.mxu1 }
 0x14b   : > { %v960_v20 = vadd.f32 %v959_v8, %v870_v7 }
 0x14c   : > { %v1136_v10 = vadd.f32 %v1135_v5, %v1047_v6 }
 0x14e   : > { %v1197_v13 = vadd.f32 %v1136_v10, %v617_v9 }
 0x150   : > { %1229 = vst [vmem:[#allocation2 + $0x60] sm:$0xff] %v1197_v13 }
 0x151   : > { %v1048_v21 = vpop.f32.mrf.mxu2  ;;  %v873_v26 = vpop.f32.mrf.mxu0 }
 0x152   : > { %v1137_v22 = vpop.f32.mrf.mxu3  ;;  %v1049_v25 = vadd.f32 %v1048_v21, %v960_v20  ;;  %v962_v27 = vpop.f32.mrf.mxu1  ;;  %v624_v20 = vld [vmem:[#allocation2 + $0xc8] sm:$0xff] }
 0x153   : > { %v963_v33 = vadd.f32 %v962_v27, %v873_v26 }
 0x154   : > { %v1138_v31 = vadd.f32 %v1137_v22, %v1049_v25  ;;  %912 = vmatmul.bf16.gmra.mxu0 %v537_v23 }
 0x155   : > { %1001 = vmatmul.bf16.gmra.mxu1 %v538_v24 }
 0x156   : > { %v1198_v32 = vadd.f32 %v1138_v31, %v618_v30  ;;  %1090 = vmatmul.bf16.gmra.mxu2 %v539_v28 }
 0x157   : > { %1179 = vmatmul.bf16.gmra.mxu3 %v540_v29  ;;  %v625_v29 = vld [vmem:[#allocation2 + $0xe0] sm:$0xff] }
 0x158   : > { %1230 = vst [vmem:[#allocation2 + $0xf0] sm:$0xff] %v1198_v32 }
 0x159   : > { %v1051_v34 = vpop.f32.mrf.mxu2  ;;  %v875_v37 = vpop.f32.mrf.mxu0 }
 0x15a   : > { %v1140_v35 = vpop.f32.mrf.mxu3  ;;  %v1052_v36 = vadd.f32 %v1051_v34, %v963_v33  ;;  %v964_v38 = vpop.f32.mrf.mxu1 }
 0x15b   : > { %v965_v42 = vadd.f32 %v964_v38, %v875_v37  ;;  %v626_v38 = vld [vmem:[#allocation2 + $0x90] sm:$0xff] }
 0x15c   : > { %v1141_v40 = vadd.f32 %v1140_v35, %v1052_v36 }
 0x15e   : > { %v1199_v41 = vadd.f32 %v1141_v40, %v619_v39 }
 0x160   : > { %1231 = vst [vmem:[#allocation2 + $0x8] sm:$0xff] %v1199_v41 }
 0x161   : > { %v1053_v43 = vpop.f32.mrf.mxu2  ;;  %v878_v46 = vpop.f32.mrf.mxu0 }
 0x162   : > { %v1142_v44 = vpop.f32.mrf.mxu3  ;;  %v1054_v45 = vadd.f32 %v1053_v43, %v965_v42  ;;  %v967_v47 = vpop.f32.mrf.mxu1 }
 0x163   : > { %v968_v51 = vadd.f32 %v967_v47, %v878_v46  ;;  %v627_v47 = vld [vmem:[#allocation2 + $0x70] sm:$0xff] }
 0x164   : > { %v1143_v49 = vadd.f32 %v1142_v44, %v1054_v45 }
 0x166   : > { %v1200_v50 = vadd.f32 %v1143_v49, %v620_v48 }
 0x168   : > { %1232 = vst [vmem:[#allocation2 + $0x78] sm:$0xff] %v1200_v50 }
 0x169   : > { %v1056_v52 = vpop.f32.mrf.mxu2  ;;  %v880_v55 = vpop.f32.mrf.mxu0 }
 0x16a   : > { %v1145_v53 = vpop.f32.mrf.mxu3  ;;  %v1057_v54 = vadd.f32 %v1056_v52, %v968_v51  ;;  %v969_v56 = vpop.f32.mrf.mxu1 }
 0x16b   : > { %v970_v60 = vadd.f32 %v969_v56, %v880_v55  ;;  %v628_v56 = vld [vmem:[#allocation2 + $0xc0] sm:$0xff] }
 0x16c   : > { %v1146_v58 = vadd.f32 %v1145_v53, %v1057_v54 }
 0x16e   : > { %v1201_v59 = vadd.f32 %v1146_v58, %v621_v57 }
 0x170   : > { %1233 = vst [vmem:[#allocation2 + $0x38] sm:$0xff] %v1201_v59 }
 0x171   : > { %v1058_v61 = vpop.f32.mrf.mxu2  ;;  %v883_v0 = vpop.f32.mrf.mxu0 }
 0x172   : > { %v1147_v62 = vpop.f32.mrf.mxu3  ;;  %v1059_v63 = vadd.f32 %v1058_v61, %v970_v60  ;;  %v972_v1 = vpop.f32.mrf.mxu1 }
 0x173   : > { %v973_v5 = vadd.f32 %v972_v1, %v883_v0  ;;  %v629_v1 = vld [vmem:[#allocation2 + $0xa8] sm:$0xff] }
 0x174   : > { %v1148_v3 = vadd.f32 %v1147_v62, %v1059_v63 }
 0x176   : > { %v1202_v4 = vadd.f32 %v1148_v3, %v622_v2 }
 0x178   : > { %1234 = vst [vmem:[#allocation2 + $0x58] sm:$0xff] %v1202_v4 }
 0x179   : > { %v1061_v6 = vpop.f32.mrf.mxu2  ;;  %v885_v9 = vpop.f32.mrf.mxu0 }
 0x17a   : > { %v1150_v7 = vpop.f32.mrf.mxu3  ;;  %v1062_v8 = vadd.f32 %v1061_v6, %v973_v5  ;;  %v974_v10 = vpop.f32.mrf.mxu1 }
 0x17b   : > { %v975_v14 = vadd.f32 %v974_v10, %v885_v9  ;;  %v630_v10 = vld [vmem:[#allocation2 + $0xd0] sm:$0xff] }
 0x17c   : > { %v1151_v12 = vadd.f32 %v1150_v7, %v1062_v8 }
 0x17e   : > { %v1203_v13 = vadd.f32 %v1151_v12, %v623_v11 }
 0x180   : > { %1235 = vst [vmem:[#allocation2 + $0x40] sm:$0xff] %v1203_v13 }
 0x181   : > { %v1063_v15 = vpop.f32.mrf.mxu2  ;;  %v888_v18 = vpop.f32.mrf.mxu0 }
 0x182   : > { %v1152_v16 = vpop.f32.mrf.mxu3  ;;  %v1064_v17 = vadd.f32 %v1063_v15, %v975_v14  ;;  %v977_v19 = vpop.f32.mrf.mxu1 }
 0x183   : > { %v978_v23 = vadd.f32 %v977_v19, %v888_v18  ;;  %v631_v19 = vld [vmem:[#allocation2 + $0x10] sm:$0xff] }
 0x184   : > { %v1153_v21 = vadd.f32 %v1152_v16, %v1064_v17 }
 0x186   : > { %v1204_v22 = vadd.f32 %v1153_v21, %v624_v20 }
 0x188   : > { %1236 = vst [vmem:[#allocation2 + $0xc8] sm:$0xff] %v1204_v22 }
 0x189   : > { %v1066_v24 = vpop.f32.mrf.mxu2  ;;  %v890_v27 = vpop.f32.mrf.mxu0 }
 0x18a   : > { %v1155_v25 = vpop.f32.mrf.mxu3  ;;  %v1067_v26 = vadd.f32 %v1066_v24, %v978_v23  ;;  %v979_v28 = vpop.f32.mrf.mxu1 }
 0x18b   : > { %v980_v32 = vadd.f32 %v979_v28, %v890_v27  ;;  %v632_v28 = vld [vmem:[#allocation2 + $0x28] sm:$0xff] }
 0x18c   : > { %v1156_v30 = vadd.f32 %v1155_v25, %v1067_v26 }
 0x18e   : > { %v1205_v31 = vadd.f32 %v1156_v30, %v625_v29 }
 0x190   : > { %1237 = vst [vmem:[#allocation2 + $0xe0] sm:$0xff] %v1205_v31 }
 0x191   : > { %v1068_v33 = vpop.f32.mrf.mxu2  ;;  %v893_v36 = vpop.f32.mrf.mxu0 }
 0x192   : > { %v1157_v34 = vpop.f32.mrf.mxu3  ;;  %v1069_v35 = vadd.f32 %v1068_v33, %v980_v32  ;;  %v982_v37 = vpop.f32.mrf.mxu1 }
 0x193   : > { %v983_v41 = vadd.f32 %v982_v37, %v893_v36  ;;  %v633_v37 = vld [vmem:[#allocation2 + $0xa0] sm:$0xff] }
 0x194   : > { %v1158_v39 = vadd.f32 %v1157_v34, %v1069_v35 }
 0x196   : > { %v1206_v40 = vadd.f32 %v1158_v39, %v626_v38 }
 0x198   : > { %1238 = vst [vmem:[#allocation2 + $0x90] sm:$0xff] %v1206_v40 }
 0x199   : > { %v1071_v42 = vpop.f32.mrf.mxu2  ;;  %v895_v45 = vpop.f32.mrf.mxu0 }
 0x19a   : > { %v1160_v43 = vpop.f32.mrf.mxu3  ;;  %v1072_v44 = vadd.f32 %v1071_v42, %v983_v41  ;;  %v984_v46 = vpop.f32.mrf.mxu1 }
 0x19b   : > { %v985_v50 = vadd.f32 %v984_v46, %v895_v45 }
 0x19c   : > { %v1161_v48 = vadd.f32 %v1160_v43, %v1072_v44  ;;  %v634_v44 = vld [vmem:[#allocation2 + $0xf8] sm:$0xff] }
 0x19e   : > { %v1207_v49 = vadd.f32 %v1161_v48, %v627_v47 }
 0x1a0   : > { %1239 = vst [vmem:[#allocation2 + $0x70] sm:$0xff] %v1207_v49 }
 0x1a1   : > { %v1073_v51 = vpop.f32.mrf.mxu2  ;;  %v898_v54 = vpop.f32.mrf.mxu0 }
 0x1a2   : > { %v1162_v52 = vpop.f32.mrf.mxu3  ;;  %v1074_v53 = vadd.f32 %v1073_v51, %v985_v50  ;;  %v987_v55 = vpop.f32.mrf.mxu1 }
 0x1a3   : > { %v988_v59 = vadd.f32 %v987_v55, %v898_v54 }
 0x1a4   : > { %v1163_v57 = vadd.f32 %v1162_v52, %v1074_v53  ;;  %v635_v53 = vld [vmem:[#allocation2 + $0x20] sm:$0xff] }
 0x1a6   : > { %v1208_v58 = vadd.f32 %v1163_v57, %v628_v56 }
 0x1a8   : > { %1240 = vst [vmem:[#allocation2 + $0xc0] sm:$0xff] %v1208_v58 }
 0x1a9   : > { %v1076_v60 = vpop.f32.mrf.mxu2  ;;  %v900_v63 = vpop.f32.mrf.mxu0 }
 0x1aa   : > { %v1165_v61 = vpop.f32.mrf.mxu3  ;;  %v1077_v62 = vadd.f32 %v1076_v60, %v988_v59  ;;  %v989_v0 = vpop.f32.mrf.mxu1 }
 0x1ab   : > { %v990_v4 = vadd.f32 %v989_v0, %v900_v63 }
 0x1ac   : > { %v1166_v2 = vadd.f32 %v1165_v61, %v1077_v62  ;;  %v636_v61 = vld [vmem:[#allocation2 + $0x98] sm:$0xff] }
 0x1ae   : > { %v1209_v3 = vadd.f32 %v1166_v2, %v629_v1 }
 0x1b0   : > { %1241 = vst [vmem:[#allocation2 + $0xa8] sm:$0xff] %v1209_v3 }
 0x1b1   : > { %v1078_v5 = vpop.f32.mrf.mxu2  ;;  %v903_v8 = vpop.f32.mrf.mxu0 }
 0x1b2   : > { %v1167_v6 = vpop.f32.mrf.mxu3  ;;  %v1079_v7 = vadd.f32 %v1078_v5, %v990_v4  ;;  %v992_v9 = vpop.f32.mrf.mxu1 }
 0x1b3   : > { %v993_v13 = vadd.f32 %v992_v9, %v903_v8 }
 0x1b4   : > { %v1168_v11 = vadd.f32 %v1167_v6, %v1079_v7 }
 0x1b6   : > { %v1210_v12 = vadd.f32 %v1168_v11, %v630_v10 }
 0x1b8   : > { %1242 = vst [vmem:[#allocation2 + $0xd0] sm:$0xff] %v1210_v12 }
 0x1b9   : > { %v1081_v14 = vpop.f32.mrf.mxu2  ;;  %v905_v17 = vpop.f32.mrf.mxu0 }
 0x1ba   : > { %v1170_v15 = vpop.f32.mrf.mxu3  ;;  %v1082_v16 = vadd.f32 %v1081_v14, %v993_v13  ;;  %v994_v18 = vpop.f32.mrf.mxu1 }
 0x1bb   : > { %v995_v22 = vadd.f32 %v994_v18, %v905_v17 }
 0x1bc   : > { %v1171_v20 = vadd.f32 %v1170_v15, %v1082_v16 }
 0x1be   : > { %v1211_v21 = vadd.f32 %v1171_v20, %v631_v19 }
 0x1c0   : > { %1243 = vst [vmem:[#allocation2 + $0x10] sm:$0xff] %v1211_v21 }
 0x1c1   : > { %v1083_v23 = vpop.f32.mrf.mxu2  ;;  %v908_v26 = vpop.f32.mrf.mxu0 }
 0x1c2   : > { %v1172_v24 = vpop.f32.mrf.mxu3  ;;  %v1084_v25 = vadd.f32 %v1083_v23, %v995_v22  ;;  %v997_v27 = vpop.f32.mrf.mxu1 }
 0x1c3   : > { %v998_v31 = vadd.f32 %v997_v27, %v908_v26 }
 0x1c4   : > { %v1173_v29 = vadd.f32 %v1172_v24, %v1084_v25 }
 0x1c6   : > { %v1212_v30 = vadd.f32 %v1173_v29, %v632_v28 }
 0x1c8   : > { %1244 = vst [vmem:[#allocation2 + $0x28] sm:$0xff] %v1212_v30 }
 0x1c9   : > { %v1086_v32 = vpop.f32.mrf.mxu2  ;;  %v910_v35 = vpop.f32.mrf.mxu0 }
 0x1ca   : > { %v1175_v33 = vpop.f32.mrf.mxu3  ;;  %v1087_v34 = vadd.f32 %v1086_v32, %v998_v31  ;;  %v999_v36 = vpop.f32.mrf.mxu1 }
 0x1cb   : > { %v1000_v40 = vadd.f32 %v999_v36, %v910_v35 }
 0x1cc   : > { %v1176_v38 = vadd.f32 %v1175_v33, %v1087_v34 }
 0x1ce   : > { %v1213_v39 = vadd.f32 %v1176_v38, %v633_v37 }
 0x1d0   : > { %1245 = vst [vmem:[#allocation2 + $0xa0] sm:$0xff] %v1213_v39 }
 0x1d1   : > { %v1088_v41 = vpop.f32.mrf.mxu2  ;;  %v913_v45 = vpop.f32.mrf.mxu0 }
 0x1d2   : > { %v1177_v42 = vpop.f32.mrf.mxu3  ;;  %v1089_v43 = vadd.f32 %v1088_v41, %v1000_v40  ;;  %v1002_v46 = vpop.f32.mrf.mxu1 }
 0x1d3   : > { %v1003_v49 = vadd.f32 %v1002_v46, %v913_v45 }
 0x1d4   : > { %v1178_v47 = vadd.f32 %v1177_v42, %v1089_v43 }
 0x1d6   : > { %v1214_v48 = vadd.f32 %v1178_v47, %v634_v44 }
 0x1d8   : > { %1246 = vst [vmem:[#allocation2 + $0xf8] sm:$0xff] %v1214_v48 }
 0x1d9   : > { %v1091_v50 = vpop.f32.mrf.mxu2  ;;  %v915_v55 = vpop.f32.mrf.mxu0 }
 0x1da   : > { %v1180_v51 = vpop.f32.mrf.mxu3  ;;  %v1092_v52 = vadd.f32 %v1091_v50, %v1003_v49  ;;  %v1004_v56 = vpop.f32.mrf.mxu1 }
 0x1db   : > { %v1005_v58 = vadd.f32 %v1004_v56, %v915_v55 }
 0x1dc   : > { %v1181_v54 = vadd.f32 %v1180_v51, %v1092_v52 }
 0x1de   : > { %v1215_v57 = vadd.f32 %v1181_v54, %v635_v53 }
 0x1e0   : > { %1247 = vst [vmem:[#allocation2 + $0x20] sm:$0xff] %v1215_v57 }
 0x1e1   : > { %v1093_v59 = vpop.f32.mrf.mxu2 }
 0x1e2   : > { %v1094_v60 = vadd.f32 %v1093_v59, %v1005_v58  ;;  %v1182_v62 = vpop.f32.mrf.mxu3 }
 0x1e4   : > { %v1183_v63 = vadd.f32 %v1182_v62, %v1094_v60  ;;  %1252 = sbr.rel (%p2087_p1) target bundleno = 832 (0x340), region = 52 }
 0x1e6   : > { %v1216_v0 = vadd.f32 %v1183_v63, %v636_v61 }
 0x1e8   : > { %1248 = vst [vmem:[#allocation2 + $0x98] sm:$0xff] %v1216_v0 }
 0x1e9   : > { %v1309_v1 = vld [vmem:[%s2974_s2 + $0xc0] sm:$0xff]  ;;  %v2339_v4 = vmov 0   ;;  %v1310_v5 = vld [vmem:[%s2974_s2 + $0xc8] sm:$0xff]  ;;  %v1303_v10 = vld [vmem:[%s2974_s2 + $0x90] sm:$0xff] }
 0x1ea   : > { %v1301_v2 = vld [vmem:[%s2974_s2 + $0x80] sm:$0xff]  ;;  %2251 = vset.pattern.permute.xlu2 %v2339_v4  ;;  %2250 = vset.pattern.permute.xlu1 %v2339_v4  ;;  %v1302_v6 = vld [vmem:[%s2974_s2 + $0x88] sm:$0xff]  ;;  %v1311_v11 = vld [vmem:[%s2974_s2 + $0xd0] sm:$0xff] }
 0x1eb   : > { %v1285_v3 = vld [vmem:[%s2974_s2] sm:$0xff]  ;;  %2249 = vset.pattern.permute.xlu0 %v2339_v4  ;;  %1439 = vperm.xlu1 %2250, %v1309_v1   ;;  %v1286_v7 = vld [vmem:[%s2974_s2 + $0x8] sm:$0xff]  ;;  %v1304_v12 = vld [vmem:[%s2974_s2 + $0x98] sm:$0xff] }
 0x1ec   : > { %1399 = vperm.xlu0 %2249, %v1301_v2   ;;  %1319 = vperm.xlu2 %2251, %v1285_v3   ;;  %v1294_v8 = vld [vmem:[%s2974_s2 + $0x48] sm:$0xff]  ;;  %v1293_v9 = vld [vmem:[%s2974_s2 + $0x40] sm:$0xff]  ;;  %v1312_v13 = vld [vmem:[%s2974_s2 + $0xd8] sm:$0xff] }
 0x1ed   : > { %v1288_v14 = vld [vmem:[%s2974_s2 + $0x18] sm:$0xff]  ;;  %v1287_v15 = vld [vmem:[%s2974_s2 + $0x10] sm:$0xff]  ;;  %v1305_v17 = vld [vmem:[%s2974_s2 + $0xa0] sm:$0xff] }
 0x1ee   : > { %v1295_v16 = vld [vmem:[%s2974_s2 + $0x50] sm:$0xff]  ;;  %v1296_v18 = vld [vmem:[%s2974_s2 + $0x58] sm:$0xff]  ;;  %v1306_v19 = vld [vmem:[%s2974_s2 + $0xa8] sm:$0xff] }
 0x1ef   : > { %v1314_v20 = vld [vmem:[%s2974_s2 + $0xe8] sm:$0xff]  ;;  %v1313_v21 = vld [vmem:[%s2974_s2 + $0xe0] sm:$0xff]  ;;  %v2164_v23 = vld [vmem:[%s2975_s3 + $0x38] sm:$0xff] }
 0x1f0   : > { %v1289_v22 = vld [vmem:[%s2974_s2 + $0x20] sm:$0xff]  ;;  %1593 = vmatpush.bf16.msra.mxu0 %v2164_v23  ;;  %2166 = vmatpush.bf16.msra.mxu2 %v2164_v23  ;;  %v1290_v25 = vld [vmem:[%s2974_s2 + $0x28] sm:$0xff]  ;;  %v2163_v27 = vld [vmem:[%s2975_s3 + $0x30] sm:$0xff] }
 0x1f1   : > { %2167 = vmatpush.bf16.msra.mxu3 %v2164_v23  ;;  %2165 = vmatpush.bf16.msra.mxu1 %v2164_v23  ;;  %v1297_v24 = vld [vmem:[%s2974_s2 + $0x60] sm:$0xff]  ;;  %v1298_v26 = vld [vmem:[%s2974_s2 + $0x68] sm:$0xff]  ;;  %v1308_v28 = vld [vmem:[%s2974_s2 + $0xb8] sm:$0xff] }
 0x1f2   : > { %v1307_v29 = vld [vmem:[%s2974_s2 + $0xb0] sm:$0xff]  ;;  %v2162_v31 = vld [vmem:[%s2975_s3 + $0x28] sm:$0xff]  ;;  %v2161_v32 = vld [vmem:[%s2975_s3 + $0x20] sm:$0xff] }
 0x1f3   : > { %1444 = vperm.xlu1 %2250, %v1310_v5   ;;  %v1315_v30 = vld [vmem:[%s2974_s2 + $0xf0] sm:$0xff]  ;;  %v1316_v34 = vld [vmem:[%s2974_s2 + $0xf8] sm:$0xff]  ;;  %v2158_v40 = vld [vmem:[%s2975_s3 + $0x8] sm:$0xff] }
 0x1f4   : > { %1404 = vperm.xlu0 %2249, %v1302_v6   ;;  %1324 = vperm.xlu2 %2251, %v1286_v7   ;;  %v1291_v33 = vld [vmem:[%s2974_s2 + $0x30] sm:$0xff]  ;;  %v1292_v35 = vld [vmem:[%s2974_s2 + $0x38] sm:$0xff]  ;;  %v2157_v41 = vld [vmem:[%s2975_s3] sm:$0xff] }
 0x1f5   : > { %1594 = vmatpush.bf16.msra.mxu0 %v2163_v27  ;;  %2169 = vmatpush.bf16.msra.mxu2 %v2163_v27  ;;  %v2160_v36 = vld [vmem:[%s2975_s3 + $0x18] sm:$0xff]  ;;  %v2159_v37 = vld [vmem:[%s2975_s3 + $0x10] sm:$0xff]  ;;  %v1254_v44 = vld [vmem:[#allocation2] sm:$0xff] }
 0x1f6   : > { %2170 = vmatpush.bf16.msra.mxu3 %v2163_v27  ;;  %2168 = vmatpush.bf16.msra.mxu1 %v2163_v27  ;;  %v1300_v38 = vld [vmem:[%s2974_s2 + $0x78] sm:$0xff]  ;;  %v1299_v39 = vld [vmem:[%s2974_s2 + $0x70] sm:$0xff]  ;;  %v1277_v52 = vld [vmem:[#allocation2 + $0xa8] sm:$0xff] }
 0x1f7   : > { %v1253_v43 = vld [vmem:[#allocation2 + $0xb0] sm:$0xff]  ;;  %v1269_v54 = vld [vmem:[#allocation2 + $0x38] sm:$0xff]  ;;  %v1262_v1 = vld [vmem:[#allocation2 + $0x88] sm:$0xff] }
 0x1f8   : > { %v1278_v53 = vld [vmem:[#allocation2 + $0xd0] sm:$0xff]  ;;  %v1270_v55 = vld [vmem:[#allocation2 + $0x58] sm:$0xff]  ;;  %v1261_v2 = vld [vmem:[#allocation2 + $0x80] sm:$0xff] }
 0x1f9   : > { %1595 = vmatpush.bf16.msra.mxu0 %v2162_v31  ;;  %2172 = vmatpush.bf16.msra.mxu2 %v2162_v31  ;;  %v1255_v23 = vld [vmem:[#allocation2 + $0xd8] sm:$0xff] }
 0x1fa   : > { %2173 = vmatpush.bf16.msra.mxu3 %v2162_v31  ;;  %2171 = vmatpush.bf16.msra.mxu1 %v2162_v31  ;;  %v1263_v31 = vld [vmem:[#allocation2 + $0xe8] sm:$0xff] }
 0x1fb   : > { %1364 = vperm.xlu1 %2250, %v1294_v8  }
 0x1fc   : > { %1359 = vperm.xlu0 %2249, %v1293_v9   ;;  %1409 = vperm.xlu2 %2251, %v1303_v10   ;;  %v1280_v9 = vld [vmem:[#allocation2 + $0x28] sm:$0xff]  ;;  %v1279_v10 = vld [vmem:[#allocation2 + $0x10] sm:$0xff] }
 0x1fd   : > { %1596 = vmatpush.bf16.msra.mxu0 %v2161_v32  ;;  %2175 = vmatpush.bf16.msra.mxu2 %v2161_v32 }
 0x1fe   : > { %2176 = vmatpush.bf16.msra.mxu3 %v2161_v32  ;;  %2174 = vmatpush.bf16.msra.mxu1 %v2161_v32  ;;  %v1264_v32 = vld [vmem:[#allocation2 + $0xb8] sm:$0xff] }
 0x201   : > { %1597 = vmatpush.bf16.msra.mxu0 %v2160_v36  ;;  %2178 = vmatpush.bf16.msra.mxu2 %v2160_v36 }
 0x202   : > { %2179 = vmatpush.bf16.msra.mxu3 %v2160_v36  ;;  %2177 = vmatpush.bf16.msra.mxu1 %v2160_v36 }
 0x203   : > { %1449 = vperm.xlu1 %2250, %v1311_v11   ;;  %v1271_v11 = vld [vmem:[#allocation2 + $0x40] sm:$0xff] }
 0x204   : > { %1414 = vperm.xlu0 %2249, %v1304_v12   ;;  %1454 = vperm.xlu2 %2251, %v1312_v13   ;;  %v1272_v12 = vld [vmem:[#allocation2 + $0xc8] sm:$0xff] }
 0x205   : > { %1598 = vmatpush.bf16.msra.mxu0 %v2159_v37  ;;  %2181 = vmatpush.bf16.msra.mxu2 %v2159_v37 }
 0x206   : > { %2182 = vmatpush.bf16.msra.mxu3 %v2159_v37  ;;  %2180 = vmatpush.bf16.msra.mxu1 %v2159_v37 }
 0x209   : > { %1599 = vmatpush.bf16.msra.mxu0 %v2158_v40  ;;  %2184 = vmatpush.bf16.msra.mxu2 %v2158_v40 }
 0x20a   : > { %2185 = vmatpush.bf16.msra.mxu3 %v2158_v40  ;;  %2183 = vmatpush.bf16.msra.mxu1 %v2158_v40 }
 0x20b   : > { %1334 = vperm.xlu1 %2250, %v1288_v14  }
 0x20c   : > { %1329 = vperm.xlu0 %2249, %v1287_v15   ;;  %1369 = vperm.xlu2 %2251, %v1295_v16  }
 0x20d   : > { %1600 = vmatpush.bf16.msra.mxu0 %v2157_v41  ;;  %2187 = vmatpush.bf16.msra.mxu2 %v2157_v41 }
 0x20e   : > { %2188 = vmatpush.bf16.msra.mxu3 %v2157_v41  ;;  %2186 = vmatpush.bf16.msra.mxu1 %v2157_v41 }
 0x213   : > { %1419 = vperm.xlu1 %2250, %v1305_v17  }
 0x214   : > { %1374 = vperm.xlu0 %2249, %v1296_v18   ;;  %1424 = vperm.xlu2 %2251, %v1306_v19  }
 0x21b   : > { %1464 = vperm.xlu1 %2250, %v1314_v20  }
 0x21c   : > { %1459 = vperm.xlu0 %2249, %v1313_v21   ;;  %1339 = vperm.xlu2 %2251, %v1289_v22   ;;  %v1256_v22 = vld [vmem:[#allocation2 + $0x18] sm:$0xff] }
 0x223   : > { %1379 = vperm.xlu1 %2250, %v1297_v24  }
 0x224   : > { %1344 = vperm.xlu0 %2249, %v1290_v25   ;;  %1384 = vperm.xlu2 %2251, %v1298_v26  }
 0x22b   : > { %1434 = vperm.xlu1 %2250, %v1308_v28  }
 0x22c   : > { %1429 = vperm.xlu0 %2249, %v1307_v29   ;;  %1469 = vperm.xlu2 %2251, %v1315_v30   ;;  %v1274_v29 = vld [vmem:[#allocation2 + $0x90] sm:$0xff]  ;;  %v1273_v30 = vld [vmem:[#allocation2 + $0xe0] sm:$0xff] }
 0x233   : > { %1349 = vperm.xlu1 %2250, %v1291_v33  }
 0x234   : > { %1474 = vperm.xlu0 %2249, %v1316_v34   ;;  %1354 = vperm.xlu2 %2251, %v1292_v35  }
 0x23b   : > { %1394 = vperm.xlu1 %2250, %v1300_v38  }
 0x23c   : > { %1389 = vperm.xlu0 %2249, %v1299_v39  }
 0x246   : > { %v1320_v42 = vpop.permute.xlu2 %1319 }
 0x247   : > { %v1477_v45 = vmul.f32 %v1320_v42, %v1253_v43  ;;  %v1282_v42 = vld [vmem:[#allocation2 + $0xf8] sm:$0xff]  ;;  %v1281_v43 = vld [vmem:[#allocation2 + $0xa0] sm:$0xff] }
 0x24e   : > { %v1325_v46 = vpop.permute.xlu2 %1324 }
 0x24f   : > { %v1478_v47 = vmul.f32 %v1325_v46, %v1254_v44 }
 0x251   : > { %v1509_v48 = vpack.c.bf16 %v1478_v47, %v1477_v45 }
 0x253   : > { %1601 = vmatmul.bf16.vlgmr.msra.gmra.mxu0 %v1509_v48 }
 0x256   : > { %v1410_v49 = vpop.permute.xlu2 %1409 }
 0x257   : > { %v1495_v17 = vmul.f32 %v1410_v49, %v1271_v11 }
 0x25d   : > { %v1440_v50 = vpop.permute.xlu1 %1439 }
 0x25e   : > { %v1400_v51 = vpop.permute.xlu0 %1399  ;;  %v1501_v57 = vmul.f32 %v1440_v50, %v1277_v52  ;;  %v1455_v61 = vpop.permute.xlu2 %1454  ;;  %v1266_v50 = vld [vmem:[#allocation2 + $0xf0] sm:$0xff] }
 0x25f   : > { %v1493_v60 = vmul.f32 %v1400_v51, %v1269_v54  ;;  %v1504_v14 = vmul.f32 %v1455_v61, %v1280_v9  ;;  %v1265_v51 = vld [vmem:[#allocation2 + $0x60] sm:$0xff]  ;;  %v1257_v52 = vld [vmem:[#allocation2 + $0x50] sm:$0xff] }
 0x260   : > { %v1283_v9 = vld [vmem:[#allocation2 + $0x20] sm:$0xff] }
 0x265   : > { %v1445_v56 = vpop.permute.xlu1 %1444 }
 0x266   : > { %v1502_v58 = vmul.f32 %v1445_v56, %v1278_v53  ;;  %v1405_v59 = vpop.permute.xlu0 %1404  ;;  %v1370_v7 = vpop.permute.xlu2 %1369  ;;  %v1258_v53 = vld [vmem:[#allocation2 + $0x68] sm:$0xff] }
 0x267   : > { %v1494_v62 = vmul.f32 %v1405_v59, %v1270_v55  ;;  %v1487_v38 = vmul.f32 %v1370_v7, %v1263_v31  ;;  %v1260_v7 = vld [vmem:[#allocation2 + $0x48] sm:$0xff] }
 0x268   : > { %v1521_v63 = vpack.c.bf16 %v1502_v58, %v1501_v57 }
 0x269   : > { %v1517_v0 = vpack.c.bf16 %v1494_v62, %v1493_v60 }
 0x26a   : > { %1661 = vmatmul.bf16.vlgmr.msra.gmra.mxu3 %v1521_v63  ;;  %v1276_v63 = vld [vmem:[#allocation2 + $0xc0] sm:$0xff] }
 0x26b   : > { %1641 = vmatmul.bf16.vlgmr.msra.gmra.mxu2 %v1517_v0  ;;  %v1275_v0 = vld [vmem:[#allocation2 + $0x70] sm:$0xff] }
 0x26d   : > { %v1365_v3 = vpop.permute.xlu1 %1364 }
 0x26e   : > { %v1486_v4 = vmul.f32 %v1365_v3, %v1262_v1  ;;  %v1360_v5 = vpop.permute.xlu0 %1359  ;;  %v1425_v21 = vpop.permute.xlu2 %1424 }
 0x26f   : > { %v1485_v6 = vmul.f32 %v1360_v5, %v1261_v2  ;;  %v1498_v35 = vmul.f32 %v1425_v21, %v1274_v29 }
 0x271   : > { %v1513_v8 = vpack.c.bf16 %v1486_v4, %v1485_v6 }
 0x273   : > { %1621 = vmatmul.bf16.vlgmr.msra.gmra.mxu1 %v1513_v8  ;;  %v1259_v8 = vld [vmem:[#allocation2 + $0x30] sm:$0xff] }
 0x275   : > { %v1450_v13 = vpop.permute.xlu1 %1449 }
 0x276   : > { %v1503_v15 = vmul.f32 %v1450_v13, %v1279_v10  ;;  %v1415_v16 = vpop.permute.xlu0 %1414  ;;  %v1340_v33 = vpop.permute.xlu2 %1339  ;;  %v1284_v10 = vld [vmem:[#allocation2 + $0x98] sm:$0xff] }
 0x277   : > { %v1496_v18 = vmul.f32 %v1415_v16, %v1272_v12  ;;  %v1481_v58 = vmul.f32 %v1340_v33, %v1257_v52 }
 0x278   : > { %v1522_v19 = vpack.c.bf16 %v1504_v14, %v1503_v15 }
 0x279   : > { %v1518_v20 = vpack.c.bf16 %v1496_v18, %v1495_v17 }
 0x27a   : > { %1666 = vmatmul.bf16.gmra.mxu3 %v1522_v19  ;;  %v1268_v19 = vld [vmem:[#allocation2 + $0x78] sm:$0xff] }
 0x27b   : > { %1646 = vmatmul.bf16.gmra.mxu2 %v1518_v20  ;;  %v1267_v20 = vld [vmem:[#allocation2 + $0x8] sm:$0xff] }
 0x27d   : > { %v1335_v24 = vpop.permute.xlu1 %1334 }
 0x27e   : > { %v1480_v25 = vmul.f32 %v1335_v24, %v1256_v22  ;;  %v1330_v26 = vpop.permute.xlu0 %1329  ;;  %v1385_v47 = vpop.permute.xlu2 %1384 }
 0x27f   : > { %v1479_v27 = vmul.f32 %v1330_v26, %v1255_v23  ;;  %v1490_v55 = vmul.f32 %v1385_v47, %v1266_v50  ;;  %v2728_v26 = vld [vmem:[%s2976_s4] ss:$0 sm:$0xff] }
 0x281   : > { %v1510_v28 = vpack.c.bf16 %v1480_v25, %v1479_v27 }
 0x283   : > { %1606 = vmatmul.bf16.gmra.mxu0 %v1510_v28 }
 0x285   : > { %v1420_v34 = vpop.permute.xlu1 %1419 }
 0x286   : > { %v1497_v36 = vmul.f32 %v1420_v34, %v1273_v30  ;;  %v1375_v37 = vpop.permute.xlu0 %1374  ;;  %v1470_v61 = vpop.permute.xlu2 %1469 }
 0x287   : > { %v1488_v39 = vmul.f32 %v1375_v37, %v1264_v32  ;;  %v1507_v15 = vmul.f32 %v1470_v61, %v1283_v9 }
 0x288   : > { %v1519_v40 = vpack.c.bf16 %v1498_v35, %v1497_v36 }
 0x289   : > { %v1514_v41 = vpack.c.bf16 %v1488_v39, %v1487_v38 }
 0x28b   : > { %1626 = vmatmul.bf16.gmra.mxu1 %v1514_v41  ;;  %1651 = vmatmul.bf16.gmra.mxu2 %v1519_v40 }
 0x28d   : > { %v1465_v44 = vpop.permute.xlu1 %1464 }
 0x28e   : > { %v1506_v45 = vmul.f32 %v1465_v44, %v1282_v42  ;;  %v1460_v46 = vpop.permute.xlu0 %1459  ;;  %v1355_v6 = vpop.permute.xlu2 %1354 }
 0x28f   : > { %v1505_v48 = vmul.f32 %v1460_v46, %v1281_v43  ;;  %v1484_v12 = vmul.f32 %v1355_v6, %v1260_v7 }
 0x291   : > { %v1523_v49 = vpack.c.bf16 %v1506_v45, %v1505_v48 }
 0x293   : > { %1671 = vmatmul.bf16.gmra.mxu3 %v1523_v49 }
 0x295   : > { %v1380_v54 = vpop.permute.xlu1 %1379 }
 0x296   : > { %v1489_v56 = vmul.f32 %v1380_v54, %v1265_v51  ;;  %v1345_v57 = vpop.permute.xlu0 %1344 }
 0x297   : > { %v1482_v59 = vmul.f32 %v1345_v57, %v1258_v53 }
 0x298   : > { %v1515_v60 = vpack.c.bf16 %v1490_v55, %v1489_v56 }
 0x299   : > { %v1511_v62 = vpack.c.bf16 %v1482_v59, %v1481_v58 }
 0x29b   : > { %1611 = vmatmul.bf16.gmra.mxu0 %v1511_v62  ;;  %1631 = vmatmul.bf16.gmra.mxu1 %v1515_v60 }
 0x29d   : > { %v1435_v1 = vpop.permute.xlu1 %1434 }
 0x29e   : > { %v1500_v2 = vmul.f32 %v1435_v1, %v1276_v63  ;;  %v1430_v3 = vpop.permute.xlu0 %1429 }
 0x29f   : > { %v1499_v4 = vmul.f32 %v1430_v3, %v1275_v0 }
 0x2a1   : > { %v1520_v5 = vpack.c.bf16 %v1500_v2, %v1499_v4 }
 0x2a3   : > { %1656 = vmatmul.bf16.gmra.mxu2 %v1520_v5 }
 0x2a5   : > { %v1350_v11 = vpop.permute.xlu1 %1349 }
 0x2a6   : > { %v1483_v13 = vmul.f32 %v1350_v11, %v1259_v8  ;;  %v1475_v14 = vpop.permute.xlu0 %1474 }
 0x2a7   : > { %v1508_v16 = vmul.f32 %v1475_v14, %v1284_v10 }
 0x2a8   : > { %v1512_v17 = vpack.c.bf16 %v1484_v12, %v1483_v13 }
 0x2a9   : > { %v1524_v18 = vpack.c.bf16 %v1508_v16, %v1507_v15 }
 0x2ab   : > { %1616 = vmatmul.bf16.gmra.mxu0 %v1512_v17  ;;  %1676 = vmatmul.bf16.gmra.mxu3 %v1524_v18 }
 0x2ad   : > { %v1395_v21 = vpop.permute.xlu1 %1394 }
 0x2ae   : > { %v1492_v22 = vmul.f32 %v1395_v21, %v1268_v19  ;;  %v1390_v23 = vpop.permute.xlu0 %1389 }
 0x2af   : > { %v1491_v24 = vmul.f32 %v1390_v23, %v1267_v20 }
 0x2b1   : > { %v1516_v25 = vpack.c.bf16 %v1492_v22, %v1491_v24 }
 0x2b3   : > { %1636 = vmatmul.bf16.gmra.mxu1 %v1516_v25 }
 0x2d0   : > { %v1602_v27 = vpop.f32.mrf.mxu0 }
 0x2d1   : > { %v1603_v28 = vadd.f32 %v2728_v26, %v1602_v27 }
 0x2d3   : > { %v1682_v29 = vpack.c.bf16 %v1603_v28, %v1603_v28  ;;  %v1746_v30 = vmax.f32 %v1603_v28, 0.0 }
 0x2d5   : > { %1714 = vst [vmem:[%s2977_s5] sm:$0xf] %v1682_v29  ;;  %v1778_v31 = vpack.c.bf16 %v1746_v30, %v1746_v30 }
 0x2d7   : > { %1810 = vst [vmem:[%s2977_s5 + $0x4] sm:$0xf] %v1778_v31 }
 0x2d8   : > { %v1604_v32 = vpop.f32.mrf.mxu0 }
 0x2d9   : > { %v1605_v33 = vadd.f32 %v2728_v26, %v1604_v32 }
 0x2db   : > { %v1683_v34 = vpack.c.bf16 %v1605_v33, %v1605_v33  ;;  %v1747_v35 = vmax.f32 %v1605_v33, 0.0 }
 0x2dd   : > { %1715 = vst [vmem:[%s2977_s5 + $0x8] sm:$0xf] %v1683_v34  ;;  %v1779_v36 = vpack.c.bf16 %v1747_v35, %v1747_v35 }
 0x2df   : > { %1811 = vst [vmem:[%s2977_s5 + $0xc] sm:$0xf] %v1779_v36 }
 0x2ed   : > { %v1662_v37 = vpop.f32.mrf.mxu3 }
 0x2ee   : > { %v1642_v38 = vpop.f32.mrf.mxu2  ;;  %v1663_v39 = vadd.f32 %v2728_v26, %v1662_v37 }
 0x2ef   : > { %v1643_v40 = vadd.f32 %v2728_v26, %v1642_v38 }
 0x2f0   : > { %v1706_v41 = vpack.c.bf16 %v1663_v39, %v1663_v39  ;;  %v1770_v42 = vmax.f32 %v1663_v39, 0.0  ;;  %v1622_v43 = vpop.f32.mrf.mxu1 }
 0x2f1   : > { %v1698_v44 = vpack.c.bf16 %v1643_v40, %v1643_v40  ;;  %v1762_v45 = vmax.f32 %v1643_v40, 0.0  ;;  %v1623_v46 = vadd.f32 %v2728_v26, %v1622_v43 }
 0x2f2   : > { %1738 = vst [vmem:[%s2977_s5 + $0xc0] sm:$0xf] %v1706_v41  ;;  %v1802_v47 = vpack.c.bf16 %v1770_v42, %v1770_v42 }
 0x2f3   : > { %1730 = vst [vmem:[%s2977_s5 + $0x80] sm:$0xf] %v1698_v44  ;;  %v1794_v48 = vpack.c.bf16 %v1762_v45, %v1762_v45  ;;  %v1690_v49 = vpack.c.bf16 %v1623_v46, %v1623_v46  ;;  %v1754_v50 = vmax.f32 %v1623_v46, 0.0 }
 0x2f4   : > { %1834 = vst [vmem:[%s2977_s5 + $0xc4] sm:$0xf] %v1802_v47 }
 0x2f5   : > { %1826 = vst [vmem:[%s2977_s5 + $0x84] sm:$0xf] %v1794_v48  ;;  %v1786_v51 = vpack.c.bf16 %v1754_v50, %v1754_v50  ;;  %v1664_v52 = vpop.f32.mrf.mxu3 }
 0x2f6   : > { %1722 = vst [vmem:[%s2977_s5 + $0x40] sm:$0xf] %v1690_v49  ;;  %v1644_v53 = vpop.f32.mrf.mxu2  ;;  %v1665_v54 = vadd.f32 %v2728_v26, %v1664_v52 }
 0x2f7   : > { %1818 = vst [vmem:[%s2977_s5 + $0x44] sm:$0xf] %v1786_v51  ;;  %v1645_v55 = vadd.f32 %v2728_v26, %v1644_v53 }
 0x2f8   : > { %v1707_v56 = vpack.c.bf16 %v1665_v54, %v1665_v54  ;;  %v1771_v57 = vmax.f32 %v1665_v54, 0.0  ;;  %v1624_v58 = vpop.f32.mrf.mxu1 }
 0x2f9   : > { %v1699_v59 = vpack.c.bf16 %v1645_v55, %v1645_v55  ;;  %v1763_v60 = vmax.f32 %v1645_v55, 0.0  ;;  %v1625_v61 = vadd.f32 %v2728_v26, %v1624_v58 }
 0x2fa   : > { %1739 = vst [vmem:[%s2977_s5 + $0xc8] sm:$0xf] %v1707_v56  ;;  %v1803_v62 = vpack.c.bf16 %v1771_v57, %v1771_v57 }
 0x2fb   : > { %1731 = vst [vmem:[%s2977_s5 + $0x88] sm:$0xf] %v1699_v59  ;;  %v1795_v63 = vpack.c.bf16 %v1763_v60, %v1763_v60  ;;  %v1691_v0 = vpack.c.bf16 %v1625_v61, %v1625_v61  ;;  %v1755_v1 = vmax.f32 %v1625_v61, 0.0 }
 0x2fc   : > { %1835 = vst [vmem:[%s2977_s5 + $0xcc] sm:$0xf] %v1803_v62 }
 0x2fd   : > { %1827 = vst [vmem:[%s2977_s5 + $0x8c] sm:$0xf] %v1795_v63  ;;  %v1787_v2 = vpack.c.bf16 %v1755_v1, %v1755_v1  ;;  %v1667_v3 = vpop.f32.mrf.mxu3 }
 0x2fe   : > { %1723 = vst [vmem:[%s2977_s5 + $0x48] sm:$0xf] %v1691_v0  ;;  %v1647_v4 = vpop.f32.mrf.mxu2  ;;  %v1668_v5 = vadd.f32 %v2728_v26, %v1667_v3 }
 0x2ff   : > { %1819 = vst [vmem:[%s2977_s5 + $0x4c] sm:$0xf] %v1787_v2  ;;  %v1648_v6 = vadd.f32 %v2728_v26, %v1647_v4 }
 0x300   : > { %v1708_v7 = vpack.c.bf16 %v1668_v5, %v1668_v5  ;;  %v1772_v8 = vmax.f32 %v1668_v5, 0.0  ;;  %v1607_v9 = vpop.f32.mrf.mxu0 }
 0x301   : > { %v1700_v10 = vpack.c.bf16 %v1648_v6, %v1648_v6  ;;  %v1764_v11 = vmax.f32 %v1648_v6, 0.0  ;;  %v1608_v12 = vadd.f32 %v2728_v26, %v1607_v9 }
 0x302   : > { %1740 = vst [vmem:[%s2977_s5 + $0xd0] sm:$0xf] %v1708_v7  ;;  %v1804_v13 = vpack.c.bf16 %v1772_v8, %v1772_v8 }
 0x303   : > { %1732 = vst [vmem:[%s2977_s5 + $0x90] sm:$0xf] %v1700_v10  ;;  %v1796_v14 = vpack.c.bf16 %v1764_v11, %v1764_v11  ;;  %v1684_v15 = vpack.c.bf16 %v1608_v12, %v1608_v12  ;;  %v1748_v16 = vmax.f32 %v1608_v12, 0.0 }
 0x304   : > { %1836 = vst [vmem:[%s2977_s5 + $0xd4] sm:$0xf] %v1804_v13 }
 0x305   : > { %1828 = vst [vmem:[%s2977_s5 + $0x94] sm:$0xf] %v1796_v14  ;;  %v1780_v17 = vpack.c.bf16 %v1748_v16, %v1748_v16  ;;  %v1669_v18 = vpop.f32.mrf.mxu3 }
 0x306   : > { %1716 = vst [vmem:[%s2977_s5 + $0x10] sm:$0xf] %v1684_v15  ;;  %v1649_v19 = vpop.f32.mrf.mxu2  ;;  %v1670_v20 = vadd.f32 %v2728_v26, %v1669_v18 }
 0x307   : > { %1812 = vst [vmem:[%s2977_s5 + $0x14] sm:$0xf] %v1780_v17  ;;  %v1650_v21 = vadd.f32 %v2728_v26, %v1649_v19 }
 0x308   : > { %v1709_v22 = vpack.c.bf16 %v1670_v20, %v1670_v20  ;;  %v1773_v23 = vmax.f32 %v1670_v20, 0.0  ;;  %v1609_v24 = vpop.f32.mrf.mxu0  ;;  %v1627_v25 = vpop.f32.mrf.mxu1 }
 0x309   : > { %v1701_v27 = vpack.c.bf16 %v1650_v21, %v1650_v21  ;;  %v1765_v28 = vmax.f32 %v1650_v21, 0.0  ;;  %v1610_v29 = vadd.f32 %v2728_v26, %v1609_v24  ;;  %v1628_v30 = vadd.f32 %v2728_v26, %v1627_v25 }
 0x30a   : > { %1741 = vst [vmem:[%s2977_s5 + $0xd8] sm:$0xf] %v1709_v22  ;;  %v1805_v31 = vpack.c.bf16 %v1773_v23, %v1773_v23 }
 0x30b   : > { %1733 = vst [vmem:[%s2977_s5 + $0x98] sm:$0xf] %v1701_v27  ;;  %v1797_v32 = vpack.c.bf16 %v1765_v28, %v1765_v28  ;;  %v1685_v33 = vpack.c.bf16 %v1610_v29, %v1610_v29  ;;  %v1749_v34 = vmax.f32 %v1610_v29, 0.0  ;;  %v1692_v35 = vpack.c.bf16 %v1628_v30, %v1628_v30 }
 0x30c   : > { %1837 = vst [vmem:[%s2977_s5 + $0xdc] sm:$0xf] %v1805_v31  ;;  %v1756_v36 = vmax.f32 %v1628_v30, 0.0 }
 0x30d   : > { %1829 = vst [vmem:[%s2977_s5 + $0x9c] sm:$0xf] %v1797_v32  ;;  %v1781_v37 = vpack.c.bf16 %v1749_v34, %v1749_v34 }
 0x30e   : > { %1717 = vst [vmem:[%s2977_s5 + $0x18] sm:$0xf] %v1685_v33  ;;  %v1788_v38 = vpack.c.bf16 %v1756_v36, %v1756_v36  ;;  %v1652_v39 = vpop.f32.mrf.mxu2 }
 0x30f   : > { %1813 = vst [vmem:[%s2977_s5 + $0x1c] sm:$0xf] %v1781_v37  ;;  %v1653_v40 = vadd.f32 %v2728_v26, %v1652_v39 }
 0x310   : > { %1724 = vst [vmem:[%s2977_s5 + $0x50] sm:$0xf] %v1692_v35  ;;  %v1629_v41 = vpop.f32.mrf.mxu1 }
 0x311   : > { %1820 = vst [vmem:[%s2977_s5 + $0x54] sm:$0xf] %v1788_v38  ;;  %v1702_v42 = vpack.c.bf16 %v1653_v40, %v1653_v40  ;;  %v1766_v43 = vmax.f32 %v1653_v40, 0.0  ;;  %v1630_v44 = vadd.f32 %v2728_v26, %v1629_v41 }
 0x313   : > { %1734 = vst [vmem:[%s2977_s5 + $0xa0] sm:$0xf] %v1702_v42  ;;  %v1798_v45 = vpack.c.bf16 %v1766_v43, %v1766_v43  ;;  %v1693_v46 = vpack.c.bf16 %v1630_v44, %v1630_v44  ;;  %v1757_v47 = vmax.f32 %v1630_v44, 0.0 }
 0x315   : > { %1830 = vst [vmem:[%s2977_s5 + $0xa4] sm:$0xf] %v1798_v45  ;;  %v1789_v48 = vpack.c.bf16 %v1757_v47, %v1757_v47 }
 0x316   : > { %1725 = vst [vmem:[%s2977_s5 + $0x58] sm:$0xf] %v1693_v46  ;;  %v1654_v49 = vpop.f32.mrf.mxu2  ;;  %v1672_v50 = vpop.f32.mrf.mxu3 }
 0x317   : > { %1821 = vst [vmem:[%s2977_s5 + $0x5c] sm:$0xf] %v1789_v48  ;;  %v1655_v51 = vadd.f32 %v2728_v26, %v1654_v49  ;;  %v1673_v52 = vadd.f32 %v2728_v26, %v1672_v50 }
 0x318   : > { %v1612_v53 = vpop.f32.mrf.mxu0  ;;  %v1632_v54 = vpop.f32.mrf.mxu1 }
 0x319   : > { %v1703_v55 = vpack.c.bf16 %v1655_v51, %v1655_v51  ;;  %v1767_v56 = vmax.f32 %v1655_v51, 0.0  ;;  %v1710_v57 = vpack.c.bf16 %v1673_v52, %v1673_v52  ;;  %v1774_v58 = vmax.f32 %v1673_v52, 0.0 }
 0x31a   : > { %v1613_v59 = vadd.f32 %v2728_v26, %v1612_v53  ;;  %v1633_v60 = vadd.f32 %v2728_v26, %v1632_v54 }
 0x31b   : > { %1735 = vst [vmem:[%s2977_s5 + $0xa8] sm:$0xf] %v1703_v55  ;;  %v1799_v61 = vpack.c.bf16 %v1767_v56, %v1767_v56  ;;  %v1806_v62 = vpack.c.bf16 %v1774_v58, %v1774_v58 }
 0x31c   : > { %1742 = vst [vmem:[%s2977_s5 + $0xe0] sm:$0xf] %v1710_v57  ;;  %v1686_v63 = vpack.c.bf16 %v1613_v59, %v1613_v59  ;;  %v1750_v0 = vmax.f32 %v1613_v59, 0.0  ;;  %v1758_v1 = vmax.f32 %v1633_v60, 0.0  ;;  %v1694_v2 = vpack.c.bf16 %v1633_v60, %v1633_v60 }
 0x31d   : > { %1831 = vst [vmem:[%s2977_s5 + $0xac] sm:$0xf] %v1799_v61 }
 0x31e   : > { %1838 = vst [vmem:[%s2977_s5 + $0xe4] sm:$0xf] %v1806_v62  ;;  %v1782_v3 = vpack.c.bf16 %v1750_v0, %v1750_v0  ;;  %v1790_v4 = vpack.c.bf16 %v1758_v1, %v1758_v1  ;;  %v1674_v5 = vpop.f32.mrf.mxu3 }
 0x31f   : > { %1718 = vst [vmem:[%s2977_s5 + $0x20] sm:$0xf] %v1686_v63  ;;  %v1675_v6 = vadd.f32 %v2728_v26, %v1674_v5 }
 0x320   : > { %1814 = vst [vmem:[%s2977_s5 + $0x24] sm:$0xf] %v1782_v3  ;;  %v1614_v7 = vpop.f32.mrf.mxu0  ;;  %v1634_v8 = vpop.f32.mrf.mxu1 }
 0x321   : > { %1726 = vst [vmem:[%s2977_s5 + $0x60] sm:$0xf] %v1694_v2  ;;  %v1711_v9 = vpack.c.bf16 %v1675_v6, %v1675_v6  ;;  %v1775_v10 = vmax.f32 %v1675_v6, 0.0  ;;  %v1615_v11 = vadd.f32 %v2728_v26, %v1614_v7  ;;  %v1635_v12 = vadd.f32 %v2728_v26, %v1634_v8 }
 0x322   : > { %1822 = vst [vmem:[%s2977_s5 + $0x64] sm:$0xf] %v1790_v4 }
 0x323   : > { %1743 = vst [vmem:[%s2977_s5 + $0xe8] sm:$0xf] %v1711_v9  ;;  %v1807_v13 = vpack.c.bf16 %v1775_v10, %v1775_v10  ;;  %v1687_v14 = vpack.c.bf16 %v1615_v11, %v1615_v11  ;;  %v1751_v15 = vmax.f32 %v1615_v11, 0.0  ;;  %v1695_v16 = vpack.c.bf16 %v1635_v12, %v1635_v12 }
 0x324   : > { %v1759_v17 = vmax.f32 %v1635_v12, 0.0 }
 0x325   : > { %1839 = vst [vmem:[%s2977_s5 + $0xec] sm:$0xf] %v1807_v13  ;;  %v1783_v18 = vpack.c.bf16 %v1751_v15, %v1751_v15 }
 0x326   : > { %1719 = vst [vmem:[%s2977_s5 + $0x28] sm:$0xf] %v1687_v14  ;;  %v1791_v19 = vpack.c.bf16 %v1759_v17, %v1759_v17  ;;  %v1657_v20 = vpop.f32.mrf.mxu2 }
 0x327   : > { %1815 = vst [vmem:[%s2977_s5 + $0x2c] sm:$0xf] %v1783_v18  ;;  %v1658_v21 = vadd.f32 %v2728_v26, %v1657_v20 }
 0x328   : > { %1727 = vst [vmem:[%s2977_s5 + $0x68] sm:$0xf] %v1695_v16  ;;  %v1617_v22 = vpop.f32.mrf.mxu0 }
 0x329   : > { %1823 = vst [vmem:[%s2977_s5 + $0x6c] sm:$0xf] %v1791_v19  ;;  %v1704_v23 = vpack.c.bf16 %v1658_v21, %v1658_v21  ;;  %v1768_v24 = vmax.f32 %v1658_v21, 0.0  ;;  %v1618_v25 = vadd.f32 %v2728_v26, %v1617_v22 }
 0x32b   : > { %1736 = vst [vmem:[%s2977_s5 + $0xb0] sm:$0xf] %v1704_v23  ;;  %v1800_v27 = vpack.c.bf16 %v1768_v24, %v1768_v24  ;;  %v1688_v28 = vpack.c.bf16 %v1618_v25, %v1618_v25  ;;  %v1752_v29 = vmax.f32 %v1618_v25, 0.0 }
 0x32d   : > { %1832 = vst [vmem:[%s2977_s5 + $0xb4] sm:$0xf] %v1800_v27  ;;  %v1784_v30 = vpack.c.bf16 %v1752_v29, %v1752_v29 }
 0x32e   : > { %1720 = vst [vmem:[%s2977_s5 + $0x30] sm:$0xf] %v1688_v28  ;;  %v1659_v31 = vpop.f32.mrf.mxu2  ;;  %v1677_v32 = vpop.f32.mrf.mxu3 }
 0x32f   : > { %1816 = vst [vmem:[%s2977_s5 + $0x34] sm:$0xf] %v1784_v30  ;;  %v1660_v33 = vadd.f32 %v2728_v26, %v1659_v31  ;;  %v1678_v34 = vadd.f32 %v2728_v26, %v1677_v32 }
 0x330   : > { %v1619_v35 = vpop.f32.mrf.mxu0  ;;  %v1637_v36 = vpop.f32.mrf.mxu1 }
 0x331   : > { %v1705_v37 = vpack.c.bf16 %v1660_v33, %v1660_v33  ;;  %v1769_v38 = vmax.f32 %v1660_v33, 0.0  ;;  %v1712_v39 = vpack.c.bf16 %v1678_v34, %v1678_v34  ;;  %v1776_v40 = vmax.f32 %v1678_v34, 0.0 }
 0x332   : > { %v1620_v41 = vadd.f32 %v2728_v26, %v1619_v35  ;;  %v1638_v42 = vadd.f32 %v2728_v26, %v1637_v36 }
 0x333   : > { %1737 = vst [vmem:[%s2977_s5 + $0xb8] sm:$0xf] %v1705_v37  ;;  %v1801_v43 = vpack.c.bf16 %v1769_v38, %v1769_v38  ;;  %v1808_v44 = vpack.c.bf16 %v1776_v40, %v1776_v40 }
 0x334   : > { %1744 = vst [vmem:[%s2977_s5 + $0xf0] sm:$0xf] %v1712_v39  ;;  %v1689_v45 = vpack.c.bf16 %v1620_v41, %v1620_v41  ;;  %v1753_v46 = vmax.f32 %v1620_v41, 0.0  ;;  %v1760_v47 = vmax.f32 %v1638_v42, 0.0  ;;  %v1696_v48 = vpack.c.bf16 %v1638_v42, %v1638_v42 }
 0x335   : > { %1833 = vst [vmem:[%s2977_s5 + $0xbc] sm:$0xf] %v1801_v43 }
 0x336   : > { %1840 = vst [vmem:[%s2977_s5 + $0xf4] sm:$0xf] %v1808_v44  ;;  %v1785_v49 = vpack.c.bf16 %v1753_v46, %v1753_v46  ;;  %v1792_v50 = vpack.c.bf16 %v1760_v47, %v1760_v47  ;;  %v1679_v51 = vpop.f32.mrf.mxu3 }
 0x337   : > { %1721 = vst [vmem:[%s2977_s5 + $0x38] sm:$0xf] %v1689_v45  ;;  %v1680_v52 = vadd.f32 %v2728_v26, %v1679_v51 }
 0x338   : > { %1817 = vst [vmem:[%s2977_s5 + $0x3c] sm:$0xf] %v1785_v49  ;;  %v1639_v53 = vpop.f32.mrf.mxu1 }
 0x339   : > { %1728 = vst [vmem:[%s2977_s5 + $0x70] sm:$0xf] %v1696_v48  ;;  %v1713_v54 = vpack.c.bf16 %v1680_v52, %v1680_v52  ;;  %v1777_v55 = vmax.f32 %v1680_v52, 0.0  ;;  %v1640_v56 = vadd.f32 %v2728_v26, %v1639_v53 }
 0x33a   : > { %1824 = vst [vmem:[%s2977_s5 + $0x74] sm:$0xf] %v1792_v50 }
 0x33b   : > { %1745 = vst [vmem:[%s2977_s5 + $0xf8] sm:$0xf] %v1713_v54  ;;  %v1809_v57 = vpack.c.bf16 %v1777_v55, %v1777_v55  ;;  %v1697_v58 = vpack.c.bf16 %v1640_v56, %v1640_v56  ;;  %v1761_v59 = vmax.f32 %v1640_v56, 0.0 }
 0x33d   : > { %1841 = vst [vmem:[%s2977_s5 + $0xfc] sm:$0xf] %v1809_v57  ;;  %v1793_v60 = vpack.c.bf16 %v1761_v59, %v1761_v59 }
 0x33e   : > { %1729 = vst [vmem:[%s2977_s5 + $0x78] sm:$0xf] %v1697_v58 }
 0x33f   : > { %1825 = vst [vmem:[%s2977_s5 + $0x7c] sm:$0xf] %v1793_v60 }
 0x340 PF: > { %s18_s23 = sadd.s32 1, %s2333_s23   ;;  %s2980_s18 = smov %s2317_s19 }
 0x341   : > { %p15_p2 = scmp.ge.s32.totalorder %s18_s23, 4   ;;  %s2981_s19 = smov %s2321_s20 }
 0x342   : > { %s2982_s20 = smov %s2419_s30  ;;  %s2983_s21 = smov %s2329_s22 }
 0x343   : > { %s2984_s22 = smov %s2986_s25  ;;  %17 = sbr.rel (!%p15_p2) target bundleno = 4 (0x4), region = 94 }
 0x348   :  { %1866 = vsyncpa [#allocation4], 1 }
 0x349   :  { %1868 = vsyncpa [#allocation4 + $0x1], 1 }

</bundles_post_ra>
